<compile_context>
chip_gen: v7x
topology: tpu7x:2x2x1
jax: 0.10.0
libtpu: 0.0.40
codegen_flags: <defaults>
</compile_context>

<pallas_src>
import jax
import jax.numpy as jnp
from jax import lax
from jax.experimental import pallas as pl
from jax.experimental.pallas import tpu as pltpu


def mlp_kernel(x_ref, w1_ref, b1_ref, w2_ref, b2_ref, w3_ref, b3_ref, o_ref):
    """One batch tile of the fused MLP, computed feature-major (batch along lanes).

    x_ref : (TB, E)   x's HBM dtype (f32); cast to the MXU operand dtype in-kernel
    w1_ref: (H1, E)   MXU operand dtype (bf16 by default)   [PyTorch [out, in] layout]
    b1_ref: (H1, 1)   f32
    w2_ref: (H2, H1)  MXU operand dtype
    b2_ref: (H2, 1)   f32
    w3_ref: (H2, 1)   f32   (final weight as a column)
    b3_ref: (1, 1)    f32, SMEM
    o_ref : (1, TB)   f32   (lane-dense; wrapper reshapes to (B, 1))
    """
    mxu_dtype = w1_ref.dtype
    # In-kernel cast of the x block: keeps HBM traffic a single f32 pass while still
    # feeding the MXU single-pass bf16 operands (cheap VPU work, hidden under the dots).
    x = x_ref[...].astype(mxu_dtype)

    # Layer 1: h1^T = W1 @ x^T -> (H1, TB). Contract E with E ("A @ B^T" form) so x needs
    # no explicit transpose and the MXU output (lane) dim is the wide TB dimension.
    h1t = lax.dot_general(
        w1_ref[...], x,
        dimension_numbers=(((1,), (1,)), ((), ())),
        preferred_element_type=jnp.float32,
    )
    h1t = jnp.maximum(h1t + b1_ref[...], 0.0)  # bias broadcast along lanes + ReLU

    # Layer 2: h2^T = W2 @ h1^T -> (H2, TB). Activations re-cast to the MXU operand dtype
    # so both matmuls stay single-pass; accumulation remains f32.
    h2t = jnp.dot(w2_ref[...], h1t.astype(mxu_dtype),
                  preferred_element_type=jnp.float32)
    h2t = jnp.maximum(h2t + b2_ref[...], 0.0)

    # TODO(synk): nn.Dropout(p=0.2) is identity in eval mode; train-mode masking would
    #             need pltpu.prng_seed / pltpu.prng_random_bits inside the kernel.

    # Final layer (out_features == 1): VPU multiply + sublane reduction instead of an
    # N=1 MXU matmul. Result is already lane-dense: (1, TB).
    out = jnp.sum(h2t * w3_ref[...], axis=0, keepdims=True) + b3_ref[0, 0]
    o_ref[...] = out.astype(o_ref.dtype)


def _round_up(v, m):
    return ((v + m - 1) // m) * m


def regression_forward(x, params, *, block_b=2048, mxu_dtype=jnp.bfloat16):
    """Forward pass of RegressionBaseModel (eval mode).

    x      : (B, E)
    params : ((w1, b1), (w2, b2), (w3, b3)) with w_i in PyTorch [out, in] layout.
    mxu_dtype: dtype of the MXU operands (bf16 default on all generations; f32 = exact).
    """
    (w1, b1), (w2, b2), (w3, b3) = params
    B, E = x.shape
    H1 = w1.shape[0]
    H2 = w2.shape[0]

    LANE = 128
    MIN_SPLIT_TILE = 1024  # only split small batches if each half still amortizes step overhead

    # Batch tiling: TB is always a multiple of 128 (lane-dense output, clean (8,128) blocks)
    # and B is padded up to TB * n_steps so every block is full (no OOB reads, no masked
    # stores). For large B we aim at block_b-sized tiles; for mid-sized B we prefer 2 steps
    # so the "parallel" grid axis can shard across both v7x TensorCores.
    Bp0 = _round_up(B, LANE)
    if Bp0 > block_b:
        n_steps = -(-Bp0 // block_b)
    elif Bp0 >= 2 * MIN_SPLIT_TILE:
        n_steps = 2
    else:
        n_steps = 1
    TB = _round_up(-(-Bp0 // n_steps), LANE)
    Bp = TB * n_steps

    xp = x if Bp == B else jnp.pad(x, ((0, Bp - B), (0, 0)))

    # Weights/biases staged once (tiny vs. x traffic). x is NOT cast in the wrapper: it
    # streams from HBM in its native dtype and is cast per-block inside the kernel.
    w1c = w1.astype(mxu_dtype)
    w2c = w2.astype(mxu_dtype)
    b1c = b1.reshape(H1, 1).astype(jnp.float32)
    b2c = b2.reshape(H2, 1).astype(jnp.float32)
    w3c = w3.reshape(H2, 1).astype(jnp.float32)
    b3c = b3.reshape(1, 1).astype(jnp.float32)

    x_bytes = jnp.dtype(x.dtype).itemsize
    w_bytes = jnp.dtype(mxu_dtype).itemsize
    cost = pl.CostEstimate(
        flops=2 * Bp * (E * H1 + H1 * H2 + H2),
        transcendentals=0,
        bytes_accessed=(Bp * E * x_bytes
                        + (H1 * E + H2 * H1) * w_bytes
                        + (H1 + H2 + H2 + 1) * 4
                        + Bp * 4),
    )

    out = pl.pallas_call(
        mlp_kernel,
        out_shape=jax.ShapeDtypeStruct((1, Bp), jnp.float32),
        grid=(n_steps,),
        in_specs=[
            pl.BlockSpec((TB, E), lambda i: (i, 0)),            # x: batch-tiled, pipelined
            pl.BlockSpec((H1, E), lambda i: (0, 0)),            # weights/biases: resident
            pl.BlockSpec((H1, 1), lambda i: (0, 0)),
            pl.BlockSpec((H2, H1), lambda i: (0, 0)),
            pl.BlockSpec((H2, 1), lambda i: (0, 0)),
            pl.BlockSpec((H2, 1), lambda i: (0, 0)),
            pl.BlockSpec(memory_space=pltpu.MemorySpace.SMEM),  # b3 scalar
        ],
        out_specs=pl.BlockSpec((1, TB), lambda i: (0, i)),      # lane-dense output blocks
        compiler_params=pltpu.CompilerParams(
            dimension_semantics=("parallel",),                  # megacore sharding (v7x)
            vmem_limit_bytes=48 * 1024 * 1024,                  # raised with the larger TB
        ),
        cost_estimate=cost,
    )(xp, w1c, b1c, w2c, b2c, w3c, b3c)

    return out.reshape(Bp, 1)[:B].astype(x.dtype)


def init_params(key, embeddings_size, linear_sizes):
    """torch.nn.Linear-style init (U[-1/sqrt(fan_in), 1/sqrt(fan_in)]), weights as [out, in]."""
    sizes = [embeddings_size] + list(linear_sizes) + [1]
    params = []
    for i in range(len(sizes) - 1):
        fan_in, fan_out = sizes[i], sizes[i + 1]
        key, kw, kb = jax.random.split(key, 3)
        bound = 1.0 / (fan_in ** 0.5)
        w = jax.random.uniform(kw, (fan_out, fan_in), jnp.float32, -bound, bound)
        b = jax.random.uniform(kb, (fan_out,), jnp.float32, -bound, bound)
        params.append((w, b))
    return tuple(params)


def reference_forward(x, params):
    """Pure-JAX reference (dropout = identity), PyTorch [out, in] weight layout."""
    (w1, b1), (w2, b2), (w3, b3) = params
    h = jnp.maximum(x @ w1.T + b1, 0.0)
    h = jnp.maximum(h @ w2.T + b2, 0.0)
    return h @ w3.T + b3


if __name__ == "__main__":
    E = 32
    linear_sizes = [64, 128]

    key = jax.random.PRNGKey(0)
    key, kx = jax.random.split(key)
    params = init_params(key, E, linear_sizes)

    # Ragged batch (padded to 1024 internally, single tile).
    B = 1000
    x = jax.random.normal(kx, (B, E), jnp.float32)
    ref = reference_forward(x, params)

    # Exact f32-operand path (numerics check).
    out_f32 = jax.block_until_ready(regression_forward(x, params, mxu_dtype=jnp.float32))
    assert out_f32.shape == (B, 1)
    assert jnp.allclose(out_f32, ref, atol=1e-4, rtol=1e-4), "f32 Pallas output mismatch"

    # Default single-pass bf16 MXU-operand path (f32 accumulation, in-kernel cast of x).
    out_bf16 = jax.block_until_ready(regression_forward(x, params))
    assert out_bf16.shape == (B, 1)
    assert jnp.allclose(out_bf16, ref, atol=5e-2, rtol=5e-2), "bf16 Pallas output mismatch"

    # Tiny batch (padded up to one 128-lane tile).
    xs = x[:8]
    outs = jax.block_until_ready(regression_forward(xs, params, mxu_dtype=jnp.float32))
    assert outs.shape == (8, 1)
    assert jnp.allclose(outs, ref[:8], atol=1e-4, rtol=1e-4), "small-B Pallas output mismatch"

    # Multi-tile grid (exercises batch pipelining, padding, and the parallel grid axis).
    B2 = 5000
    key, kx2 = jax.random.split(key)
    x2 = jax.random.normal(kx2, (B2, E), jnp.float32)
    ref2 = reference_forward(x2, params)
    out2 = jax.block_until_ready(regression_forward(x2, params, block_b=2048))
    assert out2.shape == (B2, 1)
    assert jnp.allclose(out2, ref2, atol=5e-2, rtol=5e-2), "multi-tile Pallas output mismatch"

    print("KERNEL_OK")
</pallas_src>

<mosaic_0001>
module attributes {stable_mosaic.version = 11 : i64} {
  func.func @mlp_kernel(%arg0: i32, %arg1: memref<1024x32xf32, #tpu.memory_space<vmem>>, %arg2: memref<64x32xf32, #tpu.memory_space<vmem>>, %arg3: memref<64x1xf32, #tpu.memory_space<vmem>>, %arg4: memref<128x64xf32, #tpu.memory_space<vmem>>, %arg5: memref<128x1xf32, #tpu.memory_space<vmem>>, %arg6: memref<128x1xf32, #tpu.memory_space<vmem>>, %arg7: memref<1x1xf32, #tpu.memory_space<smem>>, %arg8: memref<1x1024xf32, #tpu.memory_space<vmem>>) attributes {dimension_semantics = [#tpu.dimension_semantics<parallel>], iteration_bounds = array<i64: 1>, scalar_prefetch = 0 : i64, scratch_operands = 0 : i64, tpu.core_type = #tpu.core_type<tc>, window_params = [{transform_indices = @transform_0, window_bounds = array<i64: 1024, 32>}, {pipeline_mode = #tpu.pipeline_mode<synchronous>, transform_indices = @transform_1, window_bounds = array<i64: 64, 32>}, {pipeline_mode = #tpu.pipeline_mode<synchronous>, transform_indices = @transform_2, window_bounds = array<i64: 64, 1>}, {pipeline_mode = #tpu.pipeline_mode<synchronous>, transform_indices = @transform_3, window_bounds = array<i64: 128, 64>}, {pipeline_mode = #tpu.pipeline_mode<synchronous>, transform_indices = @transform_4, window_bounds = array<i64: 128, 1>}, {pipeline_mode = #tpu.pipeline_mode<synchronous>, transform_indices = @transform_5, window_bounds = array<i64: 128, 1>}, {transform_indices = @transform_6, window_bounds = array<i64: 1, 1>}, {transform_indices = @transform_7, window_bounds = array<i64: 1, 1024>}]} {
    %c0 = arith.constant 0 : index
    %c0_0 = arith.constant 0 : index
    %0 = vector.load %arg1[%c0, %c0_0] : memref<1024x32xf32, #tpu.memory_space<vmem>>, vector<1024x32xf32>
    %c0_1 = arith.constant 0 : index
    %c0_2 = arith.constant 0 : index
    %1 = vector.load %arg2[%c0_1, %c0_2] : memref<64x32xf32, #tpu.memory_space<vmem>>, vector<64x32xf32>
    %cst = arith.constant dense<0.000000e+00> : vector<64x1024xf32>
    %2 = tpu.matmul %1, %0, %cst {dimension_numbers = #tpu.dot_dimension_numbers<[1], [1], [0], [0], [0, 0, 1, 0], [], []>} : vector<64x32xf32>, vector<1024x32xf32>, vector<64x1024xf32> -> vector<64x1024xf32>
    %c0_3 = arith.constant 0 : index
    %c0_4 = arith.constant 0 : index
    %3 = vector.load %arg3[%c0_3, %c0_4] : memref<64x1xf32, #tpu.memory_space<vmem>>, vector<64x1xf32>
    %4 = vector.broadcast %3 : vector<64x1xf32> to vector<64x1024xf32>
    %5 = arith.addf %2, %4 : vector<64x1024xf32>
    %cst_5 = arith.constant 0.000000e+00 : f32
    %6 = vector.broadcast %cst_5 : f32 to vector<64x1024xf32>
    %7 = arith.maximumf %5, %6 : vector<64x1024xf32>
    %c0_6 = arith.constant 0 : index
    %c0_7 = arith.constant 0 : index
    %8 = vector.load %arg4[%c0_6, %c0_7] : memref<128x64xf32, #tpu.memory_space<vmem>>, vector<128x64xf32>
    %cst_8 = arith.constant dense<0.000000e+00> : vector<128x1024xf32>
    %9 = tpu.matmul %8, %7, %cst_8 {dimension_numbers = #tpu.dot_dimension_numbers<[1], [0], [0], [1], [0, 0, 1, 1], [], []>} : vector<128x64xf32>, vector<64x1024xf32>, vector<128x1024xf32> -> vector<128x1024xf32>
    %c0_9 = arith.constant 0 : index
    %c0_10 = arith.constant 0 : index
    %10 = vector.load %arg5[%c0_9, %c0_10] : memref<128x1xf32, #tpu.memory_space<vmem>>, vector<128x1xf32>
    %11 = vector.broadcast %10 : vector<128x1xf32> to vector<128x1024xf32>
    %12 = arith.addf %9, %11 : vector<128x1024xf32>
    %cst_11 = arith.constant 0.000000e+00 : f32
    %13 = vector.broadcast %cst_11 : f32 to vector<128x1024xf32>
    %14 = arith.maximumf %12, %13 : vector<128x1024xf32>
    %c0_12 = arith.constant 0 : index
    %c0_13 = arith.constant 0 : index
    %15 = vector.load %arg6[%c0_12, %c0_13] : memref<128x1xf32, #tpu.memory_space<vmem>>, vector<128x1xf32>
    %16 = vector.broadcast %15 : vector<128x1xf32> to vector<128x1024xf32>
    %17 = arith.mulf %14, %16 : vector<128x1024xf32>
    %cst_14 = arith.constant dense<0.000000e+00> : vector<1024xf32>
    %18 = vector.multi_reduction <add>, %17, %cst_14 [0] : vector<128x1024xf32> to vector<1024xf32>
    %19 = vector.shape_cast %18 : vector<1024xf32> to vector<1x1024xf32>
    %c0_15 = arith.constant 0 : index
    %c0_16 = arith.constant 0 : index
    %20 = memref.load %arg7[%c0_15, %c0_16] : memref<1x1xf32, #tpu.memory_space<smem>>
    %21 = vector.broadcast %20 : f32 to vector<1x1024xf32>
    %22 = arith.addf %19, %21 : vector<1x1024xf32>
    %c0_17 = arith.constant 0 : index
    %c0_18 = arith.constant 0 : index
    %23 = vector.load %arg8[%c0_17, %c0_18] : memref<1x1024xf32, #tpu.memory_space<vmem>>, vector<1x1024xf32>
    tpu.vector_store %arg8[%c0_17, %c0_18], %22 {strides = array<i32>} : memref<1x1024xf32, #tpu.memory_space<vmem>>, vector<1x1024xf32>,
    return
  }
  func.func @transform_0(%arg0: i32) -> (i32, i32) {
    %c0_i32 = arith.constant 0 : i32
    %c0_i32_0 = arith.constant 0 : i32
    return %arg0, %c0_i32 : i32, i32
  }
  func.func @transform_1(%arg0: i32) -> (i32, i32) {
    %c0_i32 = arith.constant 0 : i32
    %c0_i32_0 = arith.constant 0 : i32
    %c0_i32_1 = arith.constant 0 : i32
    return %c0_i32, %c0_i32_0 : i32, i32
  }
  func.func @transform_2(%arg0: i32) -> (i32, i32) {
    %c0_i32 = arith.constant 0 : i32
    %c0_i32_0 = arith.constant 0 : i32
    %c0_i32_1 = arith.constant 0 : i32
    return %c0_i32, %c0_i32_0 : i32, i32
  }
  func.func @transform_3(%arg0: i32) -> (i32, i32) {
    %c0_i32 = arith.constant 0 : i32
    %c0_i32_0 = arith.constant 0 : i32
    %c0_i32_1 = arith.constant 0 : i32
    return %c0_i32, %c0_i32_0 : i32, i32
  }
  func.func @transform_4(%arg0: i32) -> (i32, i32) {
    %c0_i32 = arith.constant 0 : i32
    %c0_i32_0 = arith.constant 0 : i32
    %c0_i32_1 = arith.constant 0 : i32
    return %c0_i32, %c0_i32_0 : i32, i32
  }
  func.func @transform_5(%arg0: i32) -> (i32, i32) {
    %c0_i32 = arith.constant 0 : i32
    %c0_i32_0 = arith.constant 0 : i32
    %c0_i32_1 = arith.constant 0 : i32
    return %c0_i32, %c0_i32_0 : i32, i32
  }
  func.func @transform_6(%arg0: i32) -> (i32, i32) {
    %c0_i32 = arith.constant 0 : i32
    %c0_i32_0 = arith.constant 0 : i32
    %c0_i32_1 = arith.constant 0 : i32
    return %c0_i32, %c0_i32_0 : i32, i32
  }
  func.func @transform_7(%arg0: i32) -> (i32, i32) {
    %c0_i32 = arith.constant 0 : i32
    %c0_i32_0 = arith.constant 0 : i32
    return %c0_i32, %arg0 : i32, i32
  }
}

</mosaic_0001>

<bundles_post_ra>
// kernel: tpu_custom_call.1
= control target key start
LH: loop header
LB: loop body
LE: loop exit
PB: predicated region body
PF: predicated region fallthrough
CT: control target
= control target key end

     0   :  { %vm212_vm0 = vcmask 261120   ;;  %v3247_v7 = vmov 0   ;;  %s4815_s0 = inlined_call_operand.vmem [shape: f32[1024,32], index: 0, kind: input, shape index: {}]   ;;  %s4816_s1 = inlined_call_operand.vmem [shape: f32[64,32], index: 1, kind: input, shape index: {}]   ;;  %s4817_s2 = inlined_call_operand.vmem [shape: f32[64,1], index: 2, kind: input, shape index: {}]   ;;  %s4818_s3 = inlined_call_operand.vmem [shape: f32[128,64], index: 3, kind: input, shape index: {}]   ;;  %s4819_s4 = inlined_call_operand.vmem [shape: f32[128,1], index: 4, kind: input, shape index: {}]   ;;  %s4820_s5 = inlined_call_operand.vmem [shape: f32[128,1], index: 5, kind: input, shape index: {}]   ;;  %s4821_s6 = inlined_call_operand.<no memory space> [shape: f32[1,1], index: 6, kind: input, shape index: {}]   ;;  %s4822_s7 = inlined_call_operand.hbm [shape: f32[1,1024], index: 7, kind: output, shape index: {}]  }
   0x1   :  { %v44_v0 = vld [vmem:[%s4815_s0 + $0x80] sm:$0xff]  ;;  %v45_v1 = vld [vmem:[%s4815_s0 + $0x88] sm:$0xff]  ;;  %vm3302_vm1 = vmpackc.low %vm212_vm0, %vm212_vm0  ;;  %3221 = vset.pattern.permute.xlu0 %v3247_v7  ;;  %3222 = vset.pattern.permute.xlu1 %v3247_v7 }
   0x2   :  { %v76_v2 = vld [vmem:[%s4815_s0 + $0x180] sm:$0xff]  ;;  %v2961_v3 = vpack.c.bf16 %v45_v1, %v44_v0  ;;  %v77_v5 = vld [vmem:[%s4815_s0 + $0x188] sm:$0xff]  ;;  %v46_v14 = vld [vmem:[%s4815_s0 + $0x90] sm:$0xff] }
   0x3   :  { %v28_v6 = vld [vmem:[%s4815_s0] sm:$0xff]  ;;  %v3009_v8 = vpack.c.bf16 %v77_v5, %v76_v2  ;;  %v29_v9 = vld [vmem:[%s4815_s0 + $0x8] sm:$0xff]  ;;  %v47_v15 = vld [vmem:[%s4815_s0 + $0x98] sm:$0xff] }
   0x4   :  { %v60_v10 = vld [vmem:[%s4815_s0 + $0x100] sm:$0xff]  ;;  %v61_v11 = vld [vmem:[%s4815_s0 + $0x108] sm:$0xff]  ;;  %2963 = vmatprep.subr.msk.bf16.mxu0 %vm3302_vm1, %v2961_v3  ;;  %v2964_v12 = vpack.c.bf16 %v29_v9, %v28_v6  ;;  %v78_v16 = vld [vmem:[%s4815_s0 + $0x190] sm:$0xff]  ;;  %v2967_v17 = vpack.c.bf16 %v47_v15, %v46_v14 }
   0x5   :  { %v3012_v13 = vpack.c.bf16 %v61_v11, %v60_v10  ;;  %3011 = vmatprep.subr.msk.bf16.mxu1 %vm3302_vm1, %v3009_v8  ;;  %v79_v18 = vld [vmem:[%s4815_s0 + $0x198] sm:$0xff]  ;;  %v30_v20 = vld [vmem:[%s4815_s0 + $0x10] sm:$0xff]  ;;  %v48_v24 = vld [vmem:[%s4815_s0 + $0xa0] sm:$0xff] }
   0x6   :  { %2966 = vmatpush3.bf16.xpose.msk.msra.mxu0 %vm3302_vm1, %v2964_v12  ;;  %v3015_v19 = vpack.c.bf16 %v79_v18, %v78_v16  ;;  %v31_v21 = vld [vmem:[%s4815_s0 + $0x18] sm:$0xff]  ;;  %v62_v22 = vld [vmem:[%s4815_s0 + $0x110] sm:$0xff]  ;;  %v49_v25 = vld [vmem:[%s4815_s0 + $0xa8] sm:$0xff] }
   0x7   :  { %3014 = vmatpush3.bf16.xpose.msk.msra.mxu1 %vm3302_vm1, %v3012_v13  ;;  %2969 = vmatprep.subr.msk.bf16.mxu0 %vm3302_vm1, %v2967_v17  ;;  %v63_v23 = vld [vmem:[%s4815_s0 + $0x118] sm:$0xff]  ;;  %v80_v26 = vld [vmem:[%s4815_s0 + $0x1a0] sm:$0xff]  ;;  %v81_v27 = vld [vmem:[%s4815_s0 + $0x1a8] sm:$0xff]  ;;  %v2970_v28 = vpack.c.bf16 %v31_v21, %v30_v20  ;;  %v2973_v30 = vpack.c.bf16 %v49_v25, %v48_v24 }
   0x8   :  { %3017 = vmatprep.subr.msk.bf16.mxu1 %vm3302_vm1, %v3015_v19  ;;  %v3018_v29 = vpack.c.bf16 %v63_v23, %v62_v22  ;;  %v3021_v31 = vpack.c.bf16 %v81_v27, %v80_v26  ;;  %v32_v32 = vld [vmem:[%s4815_s0 + $0x20] sm:$0xff]  ;;  %v33_v33 = vld [vmem:[%s4815_s0 + $0x28] sm:$0xff]  ;;  %v50_v36 = vld [vmem:[%s4815_s0 + $0xb0] sm:$0xff] }
   0x9   :  { %v64_v34 = vld [vmem:[%s4815_s0 + $0x120] sm:$0xff]  ;;  %v65_v35 = vld [vmem:[%s4815_s0 + $0x128] sm:$0xff]  ;;  %v51_v37 = vld [vmem:[%s4815_s0 + $0xb8] sm:$0xff]  ;;  %v2976_v40 = vpack.c.bf16 %v33_v33, %v32_v32 }
   0xa   :  { %v82_v38 = vld [vmem:[%s4815_s0 + $0x1b0] sm:$0xff]  ;;  %v83_v39 = vld [vmem:[%s4815_s0 + $0x1b8] sm:$0xff]  ;;  %v3024_v41 = vpack.c.bf16 %v65_v35, %v64_v34  ;;  %v2979_v42 = vpack.c.bf16 %v51_v37, %v50_v36  ;;  %v3414_v46 = vld [vmem:[%s4816_s1] sm:$0xff] }
   0xb   :  { %v3027_v43 = vpack.c.bf16 %v83_v39, %v82_v38  ;;  %v34_v44 = vld [vmem:[%s4815_s0 + $0x30] sm:$0xff]  ;;  %v35_v45 = vld [vmem:[%s4815_s0 + $0x38] sm:$0xff]  ;;  %v52_v49 = vld [vmem:[%s4815_s0 + $0xc0] sm:$0xff]  ;;  %2801 = vmatprep.mubr.msk.f32.mxu0 %vm212_vm0, %v3414_v46  ;;  %2849 = vmatprep.mubr.msk.f32.mxu1 %vm212_vm0, %v3414_v46 }
   0xc   :  { %v66_v47 = vld [vmem:[%s4815_s0 + $0x130] sm:$0xff]  ;;  %v67_v48 = vld [vmem:[%s4815_s0 + $0x138] sm:$0xff]  ;;  %v53_v50 = vld [vmem:[%s4815_s0 + $0xc8] sm:$0xff]  ;;  %v2982_v53 = vpack.c.bf16 %v35_v45, %v34_v44 }
   0xd   :  { %v84_v51 = vld [vmem:[%s4815_s0 + $0x1c0] sm:$0xff]  ;;  %v85_v52 = vld [vmem:[%s4815_s0 + $0x1c8] sm:$0xff]  ;;  %v3030_v54 = vpack.c.bf16 %v67_v48, %v66_v47  ;;  %v2985_v55 = vpack.c.bf16 %v53_v50, %v52_v49  ;;  %v54_v61 = vld [vmem:[%s4815_s0 + $0xd0] sm:$0xff] }
   0xe   :  { %2972 = vmatpush3.bf16.xpose.msk.msra.mxu0 %vm3302_vm1, %v2970_v28  ;;  %v3033_v56 = vpack.c.bf16 %v85_v52, %v84_v51  ;;  %v36_v57 = vld [vmem:[%s4815_s0 + $0x40] sm:$0xff]  ;;  %v37_v58 = vld [vmem:[%s4815_s0 + $0x48] sm:$0xff]  ;;  %v55_v62 = vld [vmem:[%s4815_s0 + $0xd8] sm:$0xff] }
   0xf   :  { %3020 = vmatpush3.bf16.xpose.msk.msra.mxu1 %vm3302_vm1, %v3018_v29  ;;  %2975 = vmatprep.subr.msk.bf16.mxu0 %vm3302_vm1, %v2973_v30  ;;  %v68_v59 = vld [vmem:[%s4815_s0 + $0x140] sm:$0xff]  ;;  %v69_v60 = vld [vmem:[%s4815_s0 + $0x148] sm:$0xff]  ;;  %v86_v63 = vld [vmem:[%s4815_s0 + $0x1d0] sm:$0xff]  ;;  %v2988_v1 = vpack.c.bf16 %v37_v58, %v36_v57  ;;  %v2991_v3 = vpack.c.bf16 %v55_v62, %v54_v61 }
  0x10   :  { %3023 = vmatprep.subr.msk.bf16.mxu1 %vm3302_vm1, %v3021_v31  ;;  %v87_v0 = vld [vmem:[%s4815_s0 + $0x1d8] sm:$0xff]  ;;  %v3036_v2 = vpack.c.bf16 %v69_v60, %v68_v59  ;;  %v38_v6 = vld [vmem:[%s4815_s0 + $0x50] sm:$0xff]  ;;  %v56_v10 = vld [vmem:[%s4815_s0 + $0xe0] sm:$0xff] }
  0x11   :  { %v3039_v5 = vpack.c.bf16 %v87_v0, %v86_v63  ;;  %v39_v7 = vld [vmem:[%s4815_s0 + $0x58] sm:$0xff]  ;;  %v70_v8 = vld [vmem:[%s4815_s0 + $0x150] sm:$0xff]  ;;  %v57_v11 = vld [vmem:[%s4815_s0 + $0xe8] sm:$0xff] }
  0x12   :  { %v71_v9 = vld [vmem:[%s4815_s0 + $0x158] sm:$0xff]  ;;  %v88_v12 = vld [vmem:[%s4815_s0 + $0x1e0] sm:$0xff]  ;;  %v89_v13 = vld [vmem:[%s4815_s0 + $0x1e8] sm:$0xff]  ;;  %v2994_v15 = vpack.c.bf16 %v39_v7, %v38_v6  ;;  %v2997_v18 = vpack.c.bf16 %v57_v11, %v56_v10 }
  0x13   :  { %v164_v14 = vld [vmem:[%s4817_s2] sm:$0xff]  ;;  %v3042_v16 = vpack.c.bf16 %v71_v9, %v70_v8  ;;  %v165_v17 = vld [vmem:[%s4817_s2 + $0x8] sm:$0xff]  ;;  %v3045_v19 = vpack.c.bf16 %v89_v13, %v88_v12  ;;  %v166_v20 = vld [vmem:[%s4817_s2 + $0x10] sm:$0xff] }
  0x14   :  { %174 = vperm.xlu0 %3221, %v164_v14   ;;  %184 = vperm.xlu1 %3222, %v166_v20   ;;  %v167_v21 = vld [vmem:[%s4817_s2 + $0x18] sm:$0xff]  ;;  %v40_v22 = vld [vmem:[%s4815_s0 + $0x60] sm:$0xff]  ;;  %v41_v23 = vld [vmem:[%s4815_s0 + $0x68] sm:$0xff] }
  0x15   :  { %v168_v24 = vld [vmem:[%s4817_s2 + $0x20] sm:$0xff]  ;;  %v73_v26 = vld [vmem:[%s4815_s0 + $0x168] sm:$0xff]  ;;  %v58_v27 = vld [vmem:[%s4815_s0 + $0xf0] sm:$0xff]  ;;  %v3000_v32 = vpack.c.bf16 %v41_v23, %v40_v22 }
  0x16   :  { %2978 = vmatpush3.bf16.xpose.msk.msra.mxu0 %vm3302_vm1, %v2976_v40  ;;  %v72_v25 = vld [vmem:[%s4815_s0 + $0x160] sm:$0xff]  ;;  %v59_v28 = vld [vmem:[%s4815_s0 + $0xf8] sm:$0xff]  ;;  %v90_v29 = vld [vmem:[%s4815_s0 + $0x1f0] sm:$0xff] }
  0x17   :  { %3026 = vmatpush3.bf16.xpose.msk.msra.mxu1 %vm3302_vm1, %v3024_v41  ;;  %2981 = vmatprep.subr.msk.bf16.mxu0 %vm3302_vm1, %v2979_v42  ;;  %v91_v30 = vld [vmem:[%s4815_s0 + $0x1f8] sm:$0xff]  ;;  %v169_v31 = vld [vmem:[%s4817_s2 + $0x28] sm:$0xff]  ;;  %v3048_v33 = vpack.c.bf16 %v73_v26, %v72_v25  ;;  %v170_v34 = vld [vmem:[%s4817_s2 + $0x30] sm:$0xff]  ;;  %v3003_v35 = vpack.c.bf16 %v59_v28, %v58_v27 }
  0x18   :  { %3029 = vmatprep.subr.msk.bf16.mxu1 %vm3302_vm1, %v3027_v43  ;;  %179 = vperm.xlu0 %3221, %v165_v17   ;;  %v3051_v36 = vpack.c.bf16 %v91_v30, %v90_v29  ;;  %v171_v37 = vld [vmem:[%s4817_s2 + $0x38] sm:$0xff]  ;;  %v42_v38 = vld [vmem:[%s4815_s0 + $0x70] sm:$0xff]  ;;  %v1153_v40 = vld [vmem:[%s4819_s4] sm:$0xff] }
  0x19   :  { %189 = vperm.xlu1 %3222, %v167_v21   ;;  %v43_v39 = vld [vmem:[%s4815_s0 + $0x78] sm:$0xff]  ;;  %v74_v41 = vld [vmem:[%s4815_s0 + $0x170] sm:$0xff]  ;;  %v108_v43 = vld [vmem:[%s4815_s0 + $0x280] sm:$0xff] }
  0x1a   :  { %v75_v42 = vld [vmem:[%s4815_s0 + $0x178] sm:$0xff]  ;;  %v109_v44 = vld [vmem:[%s4815_s0 + $0x288] sm:$0xff]  ;;  %v140_v45 = vld [vmem:[%s4815_s0 + $0x380] sm:$0xff]  ;;  %v3006_v49 = vpack.c.bf16 %v43_v39, %v42_v38 }
  0x1b   :  { %v141_v47 = vld [vmem:[%s4815_s0 + $0x388] sm:$0xff]  ;;  %v3054_v50 = vpack.c.bf16 %v75_v42, %v74_v41  ;;  %v1155_v51 = vld [vmem:[%s4819_s4 + $0x10] sm:$0xff]  ;;  %v3057_v52 = vpack.c.bf16 %v109_v44, %v108_v43 }
  0x1c   :  { %194 = vperm.xlu0 %3221, %v168_v24   ;;  %v1154_v48 = vld [vmem:[%s4819_s4 + $0x8] sm:$0xff] }
  0x1d   :  { %199 = vperm.xlu1 %3222, %v169_v31  }
  0x1e   :  { %2984 = vmatpush3.bf16.xpose.msk.msra.mxu0 %vm3302_vm1, %v2982_v53  ;;  %v3105_v53 = vpack.c.bf16 %v141_v47, %v140_v45 }
  0x1f   :  { %3032 = vmatpush3.bf16.xpose.msk.msra.mxu1 %vm3302_vm1, %v3030_v54  ;;  %2987 = vmatprep.subr.msk.bf16.mxu0 %vm3302_vm1, %v2985_v55 }
  0x20   :  { %3035 = vmatprep.subr.msk.bf16.mxu1 %vm3302_vm1, %v3033_v56  ;;  %204 = vperm.xlu0 %3221, %v170_v34  }
  0x21   :  { %209 = vperm.xlu1 %3222, %v171_v37  }
  0x24   :  { %1171 = vperm.xlu0 %3221, %v1153_v40  }
  0x25   :  { %1176 = vperm.xlu1 %3222, %v1154_v48  }
  0x26   :  { %2990 = vmatpush3.bf16.xpose.msk.msra.mxu0 %vm3302_vm1, %v2988_v1 }
  0x27   :  { %3038 = vmatpush3.bf16.xpose.msk.msra.mxu1 %vm3302_vm1, %v3036_v2  ;;  %2993 = vmatprep.subr.msk.bf16.mxu0 %vm3302_vm1, %v2991_v3 }
  0x28   :  { %3041 = vmatprep.subr.msk.bf16.mxu1 %vm3302_vm1, %v3039_v5 }
  0x2e   :  { %2996 = vmatpush3.bf16.xpose.msk.msra.mxu0 %vm3302_vm1, %v2994_v15 }
  0x2f   :  { %3044 = vmatpush3.bf16.xpose.msk.msra.mxu1 %vm3302_vm1, %v3042_v16  ;;  %2999 = vmatprep.subr.msk.bf16.mxu0 %vm3302_vm1, %v2997_v18 }
  0x30   :  { %3047 = vmatprep.subr.msk.bf16.mxu1 %vm3302_vm1, %v3045_v19 }
  0x36   :  { %3002 = vmatpush3.bf16.xpose.msk.msra.mxu0 %vm3302_vm1, %v3000_v32 }
  0x37   :  { %3050 = vmatpush3.bf16.xpose.msk.msra.mxu1 %vm3302_vm1, %v3048_v33  ;;  %3005 = vmatprep.subr.msk.bf16.mxu0 %vm3302_vm1, %v3003_v35 }
  0x38   :  { %3053 = vmatprep.subr.msk.bf16.mxu1 %vm3302_vm1, %v3051_v36 }
  0x39   :  { %13 = vsyncpa [#allocation4], 0  ;;  %1181 = vperm.xlu0 %3221, %v1155_v51   ;;  %v1156_v54 = vld [vmem:[%s4819_s4 + $0x18] sm:$0xff]  ;;  %v92_v55 = vld [vmem:[%s4815_s0 + $0x200] sm:$0xff]  ;;  %vm1249_vm2 = vcmask 523264  }
  0x3a   :  { %v2070_v56 = vld [vmem:[%s4820_s5] sm:$0xff]  ;;  %v93_v57 = vld [vmem:[%s4815_s0 + $0x208] sm:$0xff]  ;;  %v110_v60 = vld [vmem:[%s4815_s0 + $0x290] sm:$0xff]  ;;  %1186 = vperm.xlu1 %3222, %v1156_v54  }
  0x3b   :  { %v124_v58 = vld [vmem:[%s4815_s0 + $0x300] sm:$0xff]  ;;  %v125_v59 = vld [vmem:[%s4815_s0 + $0x308] sm:$0xff]  ;;  %v111_v61 = vld [vmem:[%s4815_s0 + $0x298] sm:$0xff]  ;;  %v3060_v1 = vpack.c.bf16 %v93_v57, %v92_v55 }
  0x3c   :  { %v142_v62 = vld [vmem:[%s4815_s0 + $0x390] sm:$0xff]  ;;  %v143_v63 = vld [vmem:[%s4815_s0 + $0x398] sm:$0xff]  ;;  %v2071_v0 = vld [vmem:[%s4820_s5 + $0x8] sm:$0xff]  ;;  %v3108_v2 = vpack.c.bf16 %v125_v59, %v124_v58  ;;  %v3063_v5 = vpack.c.bf16 %v111_v61, %v110_v60 }
  0x3d   :  { %2088 = vperm.xlu0 %3221, %v2070_v56   ;;  %v3647_v3 = vld [vmem:[%s4816_s1 + $0x8] sm:$0xff]  ;;  %v3111_v6 = vpack.c.bf16 %v143_v63, %v142_v62  ;;  %v3660_v7 = vld [vmem:[%s4816_s1 + $0x10] sm:$0xff]  ;;  %v95_v9 = vld [vmem:[%s4815_s0 + $0x218] sm:$0xff] }
  0x3e   :  { %3008 = vmatpush3.bf16.xpose.msk.msra.mxu0 %vm3302_vm1, %v3006_v49  ;;  %2093 = vperm.xlu1 %3222, %v2071_v0   ;;  %v94_v8 = vld [vmem:[%s4815_s0 + $0x210] sm:$0xff]  ;;  %v127_v11 = vld [vmem:[%s4815_s0 + $0x318] sm:$0xff]  ;;  %v112_v12 = vld [vmem:[%s4815_s0 + $0x2a0] sm:$0xff] }
  0x3f   :  { %3056 = vmatpush3.bf16.xpose.msk.msra.mxu1 %vm3302_vm1, %v3054_v50  ;;  %3059 = vmatprep.subr.msk.bf16.mxu0 %vm3302_vm1, %v3057_v52  ;;  %v126_v10 = vld [vmem:[%s4815_s0 + $0x310] sm:$0xff]  ;;  %v1157_v13 = vld [vmem:[%s4819_s4 + $0x20] sm:$0xff]  ;;  %v113_v15 = vld [vmem:[%s4815_s0 + $0x2a8] sm:$0xff]  ;;  %v3066_v18 = vpack.c.bf16 %v95_v9, %v94_v8 }
  0x40   :  { %3107 = vmatprep.subr.msk.bf16.mxu1 %vm3302_vm1, %v3105_v53  ;;  %v2072_v14 = vld [vmem:[%s4820_s5 + $0x10] sm:$0xff]  ;;  %v144_v16 = vld [vmem:[%s4815_s0 + $0x3a0] sm:$0xff]  ;;  %v145_v17 = vld [vmem:[%s4815_s0 + $0x3a8] sm:$0xff]  ;;  %v3114_v19 = vpack.c.bf16 %v127_v11, %v126_v10  ;;  %v3069_v21 = vpack.c.bf16 %v113_v15, %v112_v12 }
  0x41   :  { %1191 = vperm.xlu0 %3221, %v1157_v13   ;;  %v3711_v20 = vld [vmem:[%s4816_s1 + $0x18] sm:$0xff]  ;;  %v3117_v22 = vpack.c.bf16 %v145_v17, %v144_v16  ;;  %v3724_v23 = vld [vmem:[%s4816_s1 + $0x20] sm:$0xff]  ;;  %v97_v25 = vld [vmem:[%s4815_s0 + $0x228] sm:$0xff] }
  0x42   :  { %2098 = vperm.xlu1 %3222, %v2072_v14   ;;  %v96_v24 = vld [vmem:[%s4815_s0 + $0x220] sm:$0xff]  ;;  %v129_v27 = vld [vmem:[%s4815_s0 + $0x328] sm:$0xff]  ;;  %v114_v28 = vld [vmem:[%s4815_s0 + $0x2b0] sm:$0xff] }
  0x43   :  { %v128_v26 = vld [vmem:[%s4815_s0 + $0x320] sm:$0xff]  ;;  %v1158_v29 = vld [vmem:[%s4819_s4 + $0x28] sm:$0xff]  ;;  %v2073_v30 = vld [vmem:[%s4820_s5 + $0x18] sm:$0xff]  ;;  %v3072_v34 = vpack.c.bf16 %v97_v25, %v96_v24 }
  0x44   :  { %v115_v31 = vld [vmem:[%s4815_s0 + $0x2b8] sm:$0xff]  ;;  %v146_v32 = vld [vmem:[%s4815_s0 + $0x3b0] sm:$0xff]  ;;  %v3120_v35 = vpack.c.bf16 %v129_v27, %v128_v26  ;;  %v3775_v36 = vld [vmem:[%s4816_s1 + $0x28] sm:$0xff] }
  0x45   :  { %2802 = vmatmul.mubr.msk.f32.vlgmr.msra.gmra.mrb[0].mxu0 %vm212_vm0, %v3414_v46  ;;  %v147_v33 = vld [vmem:[%s4815_s0 + $0x3b8] sm:$0xff]  ;;  %1196 = vperm.xlu0 %3221, %v1158_v29   ;;  %v3075_v37 = vpack.c.bf16 %v115_v31, %v114_v28  ;;  %v3788_v39 = vld [vmem:[%s4816_s1 + $0x30] sm:$0xff]  ;;  %v116_v44 = vld [vmem:[%s4815_s0 + $0x2c0] sm:$0xff] }
  0x46   :  { %2850 = vmatmul.mubr.msk.f32.vlgmr.msra.gmra.mrb[0].mxu1 %vm212_vm0, %v3414_v46  ;;  %3062 = vmatpush3.bf16.xpose.msk.msra.mxu0 %vm3302_vm1, %v3060_v1  ;;  %v3123_v38 = vpack.c.bf16 %v147_v33, %v146_v32  ;;  %v98_v40 = vld [vmem:[%s4815_s0 + $0x230] sm:$0xff]  ;;  %v99_v41 = vld [vmem:[%s4815_s0 + $0x238] sm:$0xff]  ;;  %v2074_v47 = vld [vmem:[%s4820_s5 + $0x20] sm:$0xff] }
  0x47   :  { %3110 = vmatpush3.bf16.xpose.msk.msra.mxu1 %vm3302_vm1, %v3108_v2  ;;  %2803 = vmatprep.mubr.msk.f32.mxu0 %vm212_vm0, %v3647_v3  ;;  %v130_v42 = vld [vmem:[%s4815_s0 + $0x330] sm:$0xff]  ;;  %v131_v43 = vld [vmem:[%s4815_s0 + $0x338] sm:$0xff]  ;;  %v117_v48 = vld [vmem:[%s4815_s0 + $0x2c8] sm:$0xff]  ;;  %v3078_v51 = vpack.c.bf16 %v99_v41, %v98_v40 }
  0x48   :  { %2851 = vmatprep.mubr.msk.f32.mxu1 %vm212_vm0, %v3647_v3  ;;  %3065 = vmatprep.subr.msk.bf16.mxu0 %vm3302_vm1, %v3063_v5  ;;  %v1159_v45 = vld [vmem:[%s4819_s4 + $0x30] sm:$0xff]  ;;  %v148_v49 = vld [vmem:[%s4815_s0 + $0x3c0] sm:$0xff]  ;;  %v149_v50 = vld [vmem:[%s4815_s0 + $0x3c8] sm:$0xff]  ;;  %v3126_v52 = vpack.c.bf16 %v131_v43, %v130_v42  ;;  %v3081_v54 = vpack.c.bf16 %v117_v48, %v116_v44 }
  0x49   :  { %3113 = vmatprep.subr.msk.bf16.mxu1 %vm3302_vm1, %v3111_v6  ;;  %2804 = vmatmul.mubr.msk.f32.gmra.mrb[2].mxu0 %vm212_vm0, %v3647_v3  ;;  %v3839_v53 = vld [vmem:[%s4816_s1 + $0x38] sm:$0xff]  ;;  %v3129_v55 = vpack.c.bf16 %v149_v50, %v148_v49  ;;  %v100_v56 = vld [vmem:[%s4815_s0 + $0x240] sm:$0xff]  ;;  %v101_v57 = vld [vmem:[%s4815_s0 + $0x248] sm:$0xff] }
  0x4a   :  { %2852 = vmatmul.mubr.msk.f32.gmra.mrb[2].mxu1 %vm212_vm0, %v3647_v3  ;;  %2805 = vmatprep.mubr.msk.f32.mxu0 %vm212_vm0, %v3660_v7  ;;  %v132_v58 = vld [vmem:[%s4815_s0 + $0x340] sm:$0xff]  ;;  %v133_v59 = vld [vmem:[%s4815_s0 + $0x348] sm:$0xff]  ;;  %v118_v60 = vld [vmem:[%s4815_s0 + $0x2d0] sm:$0xff]  ;;  %v3084_v2 = vpack.c.bf16 %v101_v57, %v100_v56 }
  0x4b   :  { %2853 = vmatprep.mubr.msk.f32.mxu1 %vm212_vm0, %v3660_v7  ;;  %2103 = vperm.xlu1 %3222, %v2073_v30   ;;  %v119_v61 = vld [vmem:[%s4815_s0 + $0x2d8] sm:$0xff]  ;;  %v150_v62 = vld [vmem:[%s4815_s0 + $0x3d0] sm:$0xff]  ;;  %v2075_v1 = vld [vmem:[%s4820_s5 + $0x28] sm:$0xff]  ;;  %v3132_v5 = vpack.c.bf16 %v133_v59, %v132_v58 }
  0x4c   :  { %1201 = vperm.xlu0 %3221, %v1159_v45   ;;  %v151_v63 = vld [vmem:[%s4815_s0 + $0x3d8] sm:$0xff]  ;;  %v3087_v6 = vpack.c.bf16 %v119_v61, %v118_v60  ;;  %v1161_v9 = vld [vmem:[%s4819_s4 + $0x40] sm:$0xff]  ;;  %v2076_v10 = vld [vmem:[%s4820_s5 + $0x30] sm:$0xff] }
  0x4d   :  { %2806 = vmatmul.mubr.msk.f32.gmra.mrb[4].mxu0 %vm212_vm0, %v3660_v7  ;;  %v1160_v0 = vld [vmem:[%s4819_s4 + $0x38] sm:$0xff]  ;;  %v3135_v8 = vpack.c.bf16 %v151_v63, %v150_v62  ;;  %v102_v11 = vld [vmem:[%s4815_s0 + $0x250] sm:$0xff]  ;;  %v120_v15 = vld [vmem:[%s4815_s0 + $0x2e0] sm:$0xff] }
  0x4e   :  { %2854 = vmatmul.mubr.msk.f32.gmra.mrb[4].mxu1 %vm212_vm0, %v3660_v7  ;;  %3068 = vmatpush3.bf16.xpose.msk.msra.mxu0 %vm3302_vm1, %v3066_v18  ;;  %v103_v12 = vld [vmem:[%s4815_s0 + $0x258] sm:$0xff]  ;;  %v134_v13 = vld [vmem:[%s4815_s0 + $0x350] sm:$0xff]  ;;  %v121_v16 = vld [vmem:[%s4815_s0 + $0x2e8] sm:$0xff] }
  0x4f   :  { %3116 = vmatpush3.bf16.xpose.msk.msra.mxu1 %vm3302_vm1, %v3114_v19  ;;  %2807 = vmatprep.mubr.msk.f32.mxu0 %vm212_vm0, %v3711_v20  ;;  %v135_v14 = vld [vmem:[%s4815_s0 + $0x358] sm:$0xff]  ;;  %v152_v17 = vld [vmem:[%s4815_s0 + $0x3e0] sm:$0xff]  ;;  %v153_v18 = vld [vmem:[%s4815_s0 + $0x3e8] sm:$0xff]  ;;  %v3093_v25 = vpack.c.bf16 %v121_v16, %v120_v15 }
  0x50   :  { %2855 = vmatprep.mubr.msk.f32.mxu1 %vm212_vm0, %v3711_v20  ;;  %3071 = vmatprep.subr.msk.bf16.mxu0 %vm3302_vm1, %v3069_v21  ;;  %v1162_v19 = vld [vmem:[%s4819_s4 + $0x48] sm:$0xff]  ;;  %v2077_v21 = vld [vmem:[%s4820_s5 + $0x38] sm:$0xff]  ;;  %v3138_v24 = vpack.c.bf16 %v135_v14, %v134_v13  ;;  %v3141_v26 = vpack.c.bf16 %v153_v18, %v152_v17  ;;  %v1163_v27 = vld [vmem:[%s4819_s4 + $0x50] sm:$0xff] }
  0x51   :  { %3119 = vmatprep.subr.msk.bf16.mxu1 %vm3302_vm1, %v3117_v22  ;;  %2808 = vmatmul.mubr.msk.f32.gmra.mrb[6].mxu0 %vm212_vm0, %v3711_v20  ;;  %v3090_v22 = vpack.c.bf16 %v103_v12, %v102_v11  ;;  %v2078_v28 = vld [vmem:[%s4820_s5 + $0x40] sm:$0xff]  ;;  %v105_v30 = vld [vmem:[%s4815_s0 + $0x268] sm:$0xff]  ;;  %v122_v33 = vld [vmem:[%s4815_s0 + $0x2f0] sm:$0xff] }
  0x52   :  { %2856 = vmatmul.mubr.msk.f32.gmra.mrb[6].mxu1 %vm212_vm0, %v3711_v20  ;;  %2809 = vmatprep.mubr.msk.f32.mxu0 %vm212_vm0, %v3724_v23  ;;  %v104_v29 = vld [vmem:[%s4815_s0 + $0x260] sm:$0xff]  ;;  %v137_v32 = vld [vmem:[%s4815_s0 + $0x368] sm:$0xff]  ;;  %v106_v48 = vld [vmem:[%s4815_s0 + $0x270] sm:$0xff] }
  0x53   :  { %2857 = vmatprep.mubr.msk.f32.mxu1 %vm212_vm0, %v3724_v23  ;;  %2108 = vperm.xlu1 %3222, %v2074_v47   ;;  %v136_v31 = vld [vmem:[%s4815_s0 + $0x360] sm:$0xff]  ;;  %v2079_v40 = vld [vmem:[%s4820_s5 + $0x48] sm:$0xff]  ;;  %v3096_v41 = vpack.c.bf16 %v105_v30, %v104_v29  ;;  %v2080_v47 = vld [vmem:[%s4820_s5 + $0x50] sm:$0xff] }
  0x54   :  { %1206 = vperm.xlu0 %3221, %v1160_v0   ;;  %v3144_v42 = vpack.c.bf16 %v137_v32, %v136_v31  ;;  %v1165_v45 = vld [vmem:[%s4819_s4 + $0x60] sm:$0xff]  ;;  %v107_v49 = vld [vmem:[%s4815_s0 + $0x278] sm:$0xff]  ;;  %v138_v50 = vld [vmem:[%s4815_s0 + $0x370] sm:$0xff] }
  0x55   :  { %2810 = vmatmul.mubr.msk.f32.gmra.mrb[8].mxu0 %vm212_vm0, %v3724_v23  ;;  %v1167_v57 = vld [vmem:[%s4819_s4 + $0x70] sm:$0xff]  ;;  %v2082_v58 = vld [vmem:[%s4820_s5 + $0x60] sm:$0xff]  ;;  %v1168_v59 = vld [vmem:[%s4819_s4 + $0x78] sm:$0xff] }
  0x56   :  { %2858 = vmatmul.mubr.msk.f32.gmra.mrb[8].mxu1 %vm212_vm0, %v3724_v23  ;;  %3074 = vmatpush3.bf16.xpose.msk.msra.mxu0 %vm3302_vm1, %v3072_v34  ;;  %v123_v34 = vld [vmem:[%s4815_s0 + $0x2f8] sm:$0xff]  ;;  %v2083_v60 = vld [vmem:[%s4820_s5 + $0x68] sm:$0xff]  ;;  %v2084_v4 = vld [vmem:[%s4820_s5 + $0x70] sm:$0xff] }
  0x57   :  { %3122 = vmatpush3.bf16.xpose.msk.msra.mxu1 %vm3302_vm1, %v3120_v35  ;;  %2811 = vmatprep.mubr.msk.f32.mxu0 %vm212_vm0, %v3775_v36  ;;  %v154_v35 = vld [vmem:[%s4815_s0 + $0x3f0] sm:$0xff]  ;;  %v3099_v43 = vpack.c.bf16 %v123_v34, %v122_v33  ;;  %v2085_v61 = vld [vmem:[%s4820_s5 + $0x78] sm:$0xff] }
  0x58   :  { %2859 = vmatprep.mubr.msk.f32.mxu1 %vm212_vm0, %v3775_v36  ;;  %3077 = vmatprep.subr.msk.bf16.mxu0 %vm3302_vm1, %v3075_v37  ;;  %v155_v37 = vld [vmem:[%s4815_s0 + $0x3f8] sm:$0xff] }
  0x59   :  { %3125 = vmatprep.subr.msk.bf16.mxu1 %vm3302_vm1, %v3123_v38  ;;  %2812 = vmatmul.mubr.msk.f32.gmra.mrb[10].mxu0 %vm212_vm0, %v3775_v36  ;;  %v1164_v38 = vld [vmem:[%s4819_s4 + $0x58] sm:$0xff]  ;;  %v3147_v44 = vpack.c.bf16 %v155_v37, %v154_v35 }
  0x5a   :  { %2860 = vmatmul.mubr.msk.f32.gmra.mrb[10].mxu1 %vm212_vm0, %v3775_v36  ;;  %2813 = vmatprep.mubr.msk.f32.mxu0 %vm212_vm0, %v3788_v39 }
  0x5b   :  { %2861 = vmatprep.mubr.msk.f32.mxu1 %vm212_vm0, %v3788_v39  ;;  %2113 = vperm.xlu1 %3222, %v2075_v1  }
  0x5c   :  { %1211 = vperm.xlu0 %3221, %v1161_v9  }
  0x5d   :  { %2814 = vmatmul.mubr.msk.f32.gmra.mrb[12].mxu0 %vm212_vm0, %v3788_v39 }
  0x5e   :  { %2862 = vmatmul.mubr.msk.f32.gmra.mrb[12].mxu1 %vm212_vm0, %v3788_v39  ;;  %3080 = vmatpush3.bf16.xpose.msk.msra.mxu0 %vm3302_vm1, %v3078_v51  ;;  %v139_v51 = vld [vmem:[%s4815_s0 + $0x378] sm:$0xff] }
  0x5f   :  { %3128 = vmatpush3.bf16.xpose.msk.msra.mxu1 %vm3302_vm1, %v3126_v52  ;;  %2815 = vmatprep.mubr.msk.f32.mxu0 %vm212_vm0, %v3839_v53  ;;  %v1166_v52 = vld [vmem:[%s4819_s4 + $0x68] sm:$0xff]  ;;  %v3150_v56 = vpack.c.bf16 %v139_v51, %v138_v50 }
  0x60   :  { %2863 = vmatprep.mubr.msk.f32.mxu1 %vm212_vm0, %v3839_v53  ;;  %3083 = vmatprep.subr.msk.bf16.mxu0 %vm3302_vm1, %v3081_v54  ;;  %v2081_v54 = vld [vmem:[%s4820_s5 + $0x58] sm:$0xff] }
  0x61   :  { %3131 = vmatprep.subr.msk.bf16.mxu1 %vm3302_vm1, %v3129_v55  ;;  %2816 = vmatmul.mubr.msk.f32.gmra.mrb[14].mxu0 %vm212_vm0, %v3839_v53  ;;  %v3102_v55 = vpack.c.bf16 %v107_v49, %v106_v48 }
  0x62   :  { %2864 = vmatmul.mubr.msk.f32.gmra.mrb[14].mxu1 %vm212_vm0, %v3839_v53  ;;  %2897 = vmatprep.mubr.msk.f32.mxu0 %vm212_vm0, %v3414_v46 }
  0x63   :  { %2945 = vmatprep.mubr.msk.f32.mxu1 %vm212_vm0, %v3414_v46  ;;  %2118 = vperm.xlu1 %3222, %v2076_v10  }
  0x64   :  { %1216 = vperm.xlu0 %3221, %v1162_v19  }
  0x66   :  { %3086 = vmatpush3.bf16.xpose.msk.msra.mxu0 %vm3302_vm1, %v3084_v2 }
  0x67   :  { %3134 = vmatpush3.bf16.xpose.msk.msra.mxu1 %vm3302_vm1, %v3132_v5  ;;  %3089 = vmatprep.subr.msk.bf16.mxu0 %vm3302_vm1, %v3087_v6 }
  0x68   :  { %3137 = vmatprep.subr.msk.bf16.mxu1 %vm3302_vm1, %v3135_v8  ;;  %2123 = vperm.xlu1 %3222, %v2077_v21  }
  0x69   :  { %1221 = vperm.xlu0 %3221, %v1163_v27  }
  0x6c   :  { %2128 = vperm.xlu1 %3222, %v2078_v28  }
  0x6d   :  { %1226 = vperm.xlu0 %3221, %v1164_v38  }
  0x6e   :  { %3092 = vmatpush3.bf16.xpose.msk.msra.mxu0 %vm3302_vm1, %v3090_v22 }
  0x6f   :  { %3140 = vmatpush3.bf16.xpose.msk.msra.mxu1 %vm3302_vm1, %v3138_v24  ;;  %3095 = vmatprep.subr.msk.bf16.mxu0 %vm3302_vm1, %v3093_v25 }
  0x70   :  { %3143 = vmatprep.subr.msk.bf16.mxu1 %vm3302_vm1, %v3141_v26  ;;  %2133 = vperm.xlu1 %3222, %v2079_v40  }
  0x71   :  { %1231 = vperm.xlu0 %3221, %v1165_v45  }
  0x74   :  { %2138 = vperm.xlu1 %3222, %v2080_v47  }
  0x75   :  { %1236 = vperm.xlu0 %3221, %v1166_v52  }
  0x76   :  { %3098 = vmatpush3.bf16.xpose.msk.msra.mxu0 %vm3302_vm1, %v3096_v41 }
  0x77   :  { %3146 = vmatpush3.bf16.xpose.msk.msra.mxu1 %vm3302_vm1, %v3144_v42  ;;  %3101 = vmatprep.subr.msk.bf16.mxu0 %vm3302_vm1, %v3099_v43 }
  0x78   :  { %3149 = vmatprep.subr.msk.bf16.mxu1 %vm3302_vm1, %v3147_v44  ;;  %2143 = vperm.xlu1 %3222, %v2081_v54  }
  0x79   :  { %1241 = vperm.xlu0 %3221, %v1167_v57  }
  0x7c   :  { %2148 = vperm.xlu1 %3222, %v2082_v58  }
  0x7d   :  { %1246 = vperm.xlu0 %3221, %v1168_v59  }
  0x7e   :  { %3104 = vmatpush3.bf16.xpose.msk.msra.mxu0 %vm3302_vm1, %v3102_v55 }
  0x7f   :  { %3152 = vmatpush3.bf16.xpose.msk.msra.mxu1 %vm3302_vm1, %v3150_v56 }
  0x80   :  { %2153 = vperm.xlu1 %3222, %v2083_v60  }
  0x81   :  { %2158 = vperm.xlu0 %3221, %v2084_v4  }
  0x84   :  { %2163 = vperm.xlu1 %3222, %v2085_v61  }
  0x85   :  { %2898 = vmatmul.mubr.msk.f32.vlgmr.msra.gmra.mrb[16].mxu0 %vm212_vm0, %v3414_v46 }
  0x86   :  { %2946 = vmatmul.mubr.msk.f32.vlgmr.msra.gmra.mrb[16].mxu1 %vm212_vm0, %v3414_v46  ;;  %2899 = vmatprep.mubr.msk.f32.mxu0 %vm212_vm0, %v3647_v3  ;;  %v3248_v46 = vmov 0.0  }
  0x87   :  { %2947 = vmatprep.mubr.msk.f32.mxu1 %vm212_vm0, %v3647_v3 }
  0x89   :  { %2900 = vmatmul.mubr.msk.f32.gmra.mrb[18].mxu0 %vm212_vm0, %v3647_v3 }
  0x8a   :  { %2948 = vmatmul.mubr.msk.f32.gmra.mrb[18].mxu1 %vm212_vm0, %v3647_v3  ;;  %2901 = vmatprep.mubr.msk.f32.mxu0 %vm212_vm0, %v3660_v7 }
  0x8b   :  { %2949 = vmatprep.mubr.msk.f32.mxu1 %vm212_vm0, %v3660_v7 }
  0x8d   :  { %2902 = vmatmul.mubr.msk.f32.gmra.mrb[20].mxu0 %vm212_vm0, %v3660_v7 }
  0x8e   :  { %2950 = vmatmul.mubr.msk.f32.gmra.mrb[20].mxu1 %vm212_vm0, %v3660_v7  ;;  %2903 = vmatprep.mubr.msk.f32.mxu0 %vm212_vm0, %v3711_v20 }
  0x8f   :  { %2951 = vmatprep.mubr.msk.f32.mxu1 %vm212_vm0, %v3711_v20 }
  0x91   :  { %2904 = vmatmul.mubr.msk.f32.gmra.mrb[22].mxu0 %vm212_vm0, %v3711_v20 }
  0x92   :  { %2952 = vmatmul.mubr.msk.f32.gmra.mrb[22].mxu1 %vm212_vm0, %v3711_v20  ;;  %2905 = vmatprep.mubr.msk.f32.mxu0 %vm212_vm0, %v3724_v23 }
  0x93   :  { %2953 = vmatprep.mubr.msk.f32.mxu1 %vm212_vm0, %v3724_v23  ;;  %v4099_v3 = vpop.permute.xlu0 %174  ;;  %v4103_v62 = vpop.permute.xlu1 %184 }
  0x95   :  { %2906 = vmatmul.mubr.msk.f32.gmra.mrb[24].mxu0 %vm212_vm0, %v3724_v23 }
  0x96   :  { %2954 = vmatmul.mubr.msk.f32.gmra.mrb[24].mxu1 %vm212_vm0, %v3724_v23  ;;  %2907 = vmatprep.mubr.msk.f32.mxu0 %vm212_vm0, %v3775_v36 }
  0x97   :  { %2955 = vmatprep.mubr.msk.f32.mxu1 %vm212_vm0, %v3775_v36 }
  0x98   :  { %v4113_v31 = vpop.permute.xlu1 %189 }
  0x99   :  { %2908 = vmatmul.mubr.msk.f32.gmra.mrb[26].mxu0 %vm212_vm0, %v3775_v36 }
  0x9a   :  { %2956 = vmatmul.mubr.msk.f32.gmra.mrb[26].mxu1 %vm212_vm0, %v3775_v36  ;;  %2909 = vmatprep.mubr.msk.f32.mxu0 %vm212_vm0, %v3788_v39 }
  0x9b   :  { %2957 = vmatprep.mubr.msk.f32.mxu1 %vm212_vm0, %v3788_v39 }
  0x9d   :  { %2910 = vmatmul.mubr.msk.f32.gmra.mrb[28].mxu0 %vm212_vm0, %v3788_v39 }
  0x9e   :  { %2958 = vmatmul.mubr.msk.f32.gmra.mrb[28].mxu1 %vm212_vm0, %v3788_v39  ;;  %2911 = vmatprep.mubr.msk.f32.mxu0 %vm212_vm0, %v3839_v53  ;;  %v4101_v39 = vpop.permute.xlu0 %179 }
  0x9f   :  { %2959 = vmatprep.mubr.msk.f32.mxu1 %vm212_vm0, %v3839_v53 }
  0xa1   :  { %2912 = vmatmul.mubr.msk.f32.gmra.mrb[30].mxu0 %vm212_vm0, %v3839_v53 }
  0xa2   :  { %2960 = vmatmul.mubr.msk.f32.gmra.mrb[30].mxu1 %vm212_vm0, %v3839_v53  ;;  %1362 = vmatprep.mubr.f32.mxu0 %v3248_v46  ;;  %v4123_v61 = vpop.permute.xlu0 %194 }
  0xa3   :  { %1523 = vmatprep.mubr.f32.mxu1 %v3248_v46 }
 0x118   :  { %v687_v7 = vpop.f32.mrb[0].mxu0 }
 0x119   :  { %v800_v20 = vpop.f32.mrb[0].mxu1  ;;  %v689_v23 = vpop.f32.mrb[1].mxu0  ;;  %v688_v63 = vadd.f32 %v687_v7, %v4099_v3 }
 0x11a   :  { %v802_v36 = vpop.f32.mrb[1].mxu1  ;;  %v801_v0 = vadd.f32 %v800_v20, %v4099_v3  ;;  %v690_v53 = vadd.f32 %v689_v23, %v4099_v3  ;;  %v4125_v23 = vpop.permute.xlu1 %199 }
 0x11b   :  { %v803_v1 = vadd.f32 %v802_v36, %v4099_v3  ;;  %v1073_v13 = vmax.f32 %v688_v63, 0.0 }
 0x11c   :  { %v693_v2 = vpop.f32.mrb[2].mxu0  ;;  %v1075_v14 = vmax.f32 %v801_v0, 0.0  ;;  %v1074_v17 = vmax.f32 %v690_v53, 0.0 }
 0x11d   :  { %v806_v5 = vpop.f32.mrb[2].mxu1  ;;  %v694_v6 = vadd.f32 %v693_v2, %v4101_v39  ;;  %v695_v9 = vpop.f32.mrb[3].mxu0  ;;  %v1076_v18 = vmax.f32 %v803_v1, 0.0 }
 0x11e   :  { %v807_v8 = vadd.f32 %v806_v5, %v4101_v39  ;;  %v808_v10 = vpop.f32.mrb[3].mxu1  ;;  %v696_v11 = vadd.f32 %v695_v9, %v4101_v39 }
 0x11f   :  { %v809_v12 = vadd.f32 %v808_v10, %v4101_v39  ;;  %v1081_v15 = vmax.f32 %v694_v6, 0.0 }
 0x120   :  { %v1083_v16 = vmax.f32 %v807_v8, 0.0  ;;  %v1082_v19 = vmax.f32 %v696_v11, 0.0  ;;  %v699_v22 = vpop.f32.mrb[4].mxu0 }
 0x121   :  { %v1084_v21 = vmax.f32 %v809_v12, 0.0  ;;  %v812_v24 = vpop.f32.mrb[4].mxu1  ;;  %v3155_v25 = vpack.c.bf16 %v1081_v15, %v1073_v13  ;;  %v701_v27 = vpop.f32.mrb[5].mxu0  ;;  %v700_v32 = vadd.f32 %v699_v22, %v4103_v62 }
 0x122   :  { %v3171_v26 = vpack.c.bf16 %v1083_v16, %v1075_v14  ;;  %v814_v28 = vpop.f32.mrb[5].mxu1  ;;  %v3153_v29 = vpack.c.bf16 %v1082_v19, %v1074_v17  ;;  %v813_v33 = vadd.f32 %v812_v24, %v4103_v62  ;;  %v702_v34 = vadd.f32 %v701_v27, %v4103_v62 }
 0x123   :  { %v3169_v30 = vpack.c.bf16 %v1084_v21, %v1076_v18  ;;  %v815_v35 = vadd.f32 %v814_v28, %v4103_v62  ;;  %v1089_v47 = vmax.f32 %v700_v32, 0.0  ;;  %v4135_v28 = vpop.permute.xlu0 %204  ;;  %v4137_v32 = vpop.permute.xlu1 %209 }
 0x124   :  { %3154 = vmatprep.subr.bf16.mxu0 %v3153_v29  ;;  %v705_v37 = vpop.f32.mrb[6].mxu0  ;;  %v1091_v48 = vmax.f32 %v813_v33, 0.0  ;;  %v1090_v51 = vmax.f32 %v702_v34, 0.0 }
 0x125   :  { %3170 = vmatprep.subr.bf16.mxu1 %v3169_v30  ;;  %v818_v38 = vpop.f32.mrb[6].mxu1  ;;  %3156 = vmatpush1.bf16.msra.mxu0 %v3155_v25  ;;  %v706_v40 = vadd.f32 %v705_v37, %v4113_v31  ;;  %v707_v42 = vpop.f32.mrb[7].mxu0  ;;  %v1092_v52 = vmax.f32 %v815_v35, 0.0 }
 0x126   :  { %3172 = vmatpush1.bf16.msra.mxu1 %v3171_v26  ;;  %v819_v41 = vadd.f32 %v818_v38, %v4113_v31  ;;  %v820_v43 = vpop.f32.mrb[7].mxu1  ;;  %v708_v44 = vadd.f32 %v707_v42, %v4113_v31 }
 0x127   :  { %v821_v45 = vadd.f32 %v820_v43, %v4113_v31  ;;  %v1097_v49 = vmax.f32 %v706_v40, 0.0 }
 0x128   :  { %v1099_v50 = vmax.f32 %v819_v41, 0.0  ;;  %v1098_v54 = vmax.f32 %v708_v44, 0.0  ;;  %v711_v56 = vpop.f32.mrb[8].mxu0 }
 0x129   :  { %v1100_v55 = vmax.f32 %v821_v45, 0.0  ;;  %v824_v57 = vpop.f32.mrb[8].mxu1  ;;  %v3159_v58 = vpack.c.bf16 %v1097_v49, %v1089_v47  ;;  %v713_v60 = vpop.f32.mrb[9].mxu0  ;;  %v712_v36 = vadd.f32 %v711_v56, %v4123_v61 }
 0x12a   :  { %v3175_v59 = vpack.c.bf16 %v1099_v50, %v1091_v48  ;;  %v826_v4 = vpop.f32.mrb[9].mxu1  ;;  %v3157_v7 = vpack.c.bf16 %v1098_v54, %v1090_v51  ;;  %v825_v63 = vadd.f32 %v824_v57, %v4123_v61  ;;  %v714_v0 = vadd.f32 %v713_v60, %v4123_v61 }
 0x12b   :  { %v3173_v20 = vpack.c.bf16 %v1100_v55, %v1092_v52  ;;  %v827_v53 = vadd.f32 %v826_v4, %v4123_v61  ;;  %v1105_v12 = vmax.f32 %v712_v36, 0.0  ;;  %v4150_v4 = vld [vmem:[%s4818_s3] sm:$0xff]  ;;  %v4183_v36 = vld [vmem:[%s4818_s3 + $0x18] sm:$0xff] }
 0x12c   :  { %v717_v1 = vpop.f32.mrb[10].mxu0  ;;  %3158 = vmatprep.subr.bf16.mxu0 %v3157_v7  ;;  %v1107_v13 = vmax.f32 %v825_v63, 0.0  ;;  %v1106_v16 = vmax.f32 %v714_v0, 0.0  ;;  %v4161_v7 = vld [vmem:[%s4818_s3 + $0x8] sm:$0xff]  ;;  %v4194_v63 = vld [vmem:[%s4818_s3 + $0x20] sm:$0xff] }
 0x12d   :  { %v830_v2 = vpop.f32.mrb[10].mxu1  ;;  %3174 = vmatprep.subr.bf16.mxu1 %v3173_v20  ;;  %v718_v5 = vadd.f32 %v717_v1, %v4125_v23  ;;  %v719_v8 = vpop.f32.mrb[11].mxu0  ;;  %3160 = vmatpush1.bf16.msra.mxu0 %v3159_v58  ;;  %v1108_v17 = vmax.f32 %v827_v53, 0.0  ;;  %v4172_v20 = vld [vmem:[%s4818_s3 + $0x10] sm:$0xff]  ;;  %v4205_v0 = vld [vmem:[%s4818_s3 + $0x28] sm:$0xff] }
 0x12e   :  { %v831_v6 = vadd.f32 %v830_v2, %v4125_v23  ;;  %v832_v9 = vpop.f32.mrb[11].mxu1  ;;  %3176 = vmatpush1.bf16.msra.mxu1 %v3175_v59  ;;  %v720_v10 = vadd.f32 %v719_v8, %v4125_v23  ;;  %v4216_v53 = vld [vmem:[%s4818_s3 + $0x30] sm:$0xff]  ;;  %v4227_v8 = vld [vmem:[%s4818_s3 + $0x38] sm:$0xff] }
 0x12f   :  { %v833_v11 = vadd.f32 %v832_v9, %v4125_v23  ;;  %v1113_v14 = vmax.f32 %v718_v5, 0.0 }
 0x130   :  { %v1115_v15 = vmax.f32 %v831_v6, 0.0  ;;  %v1114_v18 = vmax.f32 %v720_v10, 0.0  ;;  %v723_v21 = vpop.f32.mrb[12].mxu0 }
 0x131   :  { %v1116_v19 = vmax.f32 %v833_v11, 0.0  ;;  %v836_v22 = vpop.f32.mrb[12].mxu1  ;;  %v3163_v24 = vpack.c.bf16 %v1113_v14, %v1105_v12  ;;  %v725_v26 = vpop.f32.mrb[13].mxu0  ;;  %v724_v33 = vadd.f32 %v723_v21, %v4135_v28 }
 0x132   :  { %v3179_v25 = vpack.c.bf16 %v1115_v15, %v1107_v13  ;;  %v838_v27 = vpop.f32.mrb[13].mxu1  ;;  %v3161_v29 = vpack.c.bf16 %v1114_v18, %v1106_v16  ;;  %v837_v34 = vadd.f32 %v836_v22, %v4135_v28  ;;  %v726_v35 = vadd.f32 %v725_v26, %v4135_v28 }
 0x133   :  { %v3177_v30 = vpack.c.bf16 %v1116_v19, %v1108_v17  ;;  %v839_v37 = vadd.f32 %v838_v27, %v4135_v28  ;;  %v1121_v48 = vmax.f32 %v724_v33, 0.0 }
 0x134   :  { %v729_v38 = vpop.f32.mrb[14].mxu0  ;;  %3162 = vmatprep.subr.bf16.mxu0 %v3161_v29  ;;  %v1123_v49 = vmax.f32 %v837_v34, 0.0  ;;  %v1122_v52 = vmax.f32 %v726_v35, 0.0 }
 0x135   :  { %v842_v40 = vpop.f32.mrb[14].mxu1  ;;  %3178 = vmatprep.subr.bf16.mxu1 %v3177_v30  ;;  %v730_v41 = vadd.f32 %v729_v38, %v4137_v32  ;;  %v731_v43 = vpop.f32.mrb[15].mxu0  ;;  %3164 = vmatpush1.bf16.msra.mxu0 %v3163_v24  ;;  %v1124_v54 = vmax.f32 %v839_v37, 0.0 }
 0x136   :  { %v843_v42 = vadd.f32 %v842_v40, %v4137_v32  ;;  %v844_v44 = vpop.f32.mrb[15].mxu1  ;;  %3180 = vmatpush1.bf16.msra.mxu1 %v3179_v25  ;;  %v732_v45 = vadd.f32 %v731_v43, %v4137_v32 }
 0x137   :  { %v845_v47 = vadd.f32 %v844_v44, %v4137_v32  ;;  %v1129_v50 = vmax.f32 %v730_v41, 0.0  ;;  %v4256_v41 = vld [vmem:[%s4818_s3 + $0x48] sm:$0xff] }
 0x138   :  { %v1131_v51 = vmax.f32 %v843_v42, 0.0  ;;  %v1130_v55 = vmax.f32 %v732_v45, 0.0 }
 0x139   :  { %v1132_v56 = vmax.f32 %v845_v47, 0.0  ;;  %v3167_v57 = vpack.c.bf16 %v1129_v50, %v1121_v48 }
 0x13a   :  { %v3183_v58 = vpack.c.bf16 %v1131_v51, %v1123_v49  ;;  %v3165_v59 = vpack.c.bf16 %v1130_v55, %v1122_v52 }
 0x13b   :  { %v3181_v60 = vpack.c.bf16 %v1132_v56, %v1124_v54 }
 0x13c   :  { %3166 = vmatprep.subr.bf16.mxu0 %v3165_v59 }
 0x13d   :  { %3182 = vmatprep.subr.bf16.mxu1 %v3181_v60  ;;  %3168 = vmatpush1.bf16.msra.mxu0 %v3167_v57 }
 0x13e   :  { %3184 = vmatpush1.bf16.msra.mxu1 %v3183_v58 }
 0x140   :  { %2705 = vmatmul.mubr.msk.f32.vlgmr.msra.gmra.mrb[32].mxu0 %vm1249_vm2, %v4150_v4 }
 0x141   :  { %2721 = vmatmul.mubr.msk.f32.vlgmr.msra.gmra.mrb[32].mxu1 %vm1249_vm2, %v4150_v4  ;;  %1368 = vmatprep.mubr.f32.mxu0 %v3248_v46 }
 0x142   :  { %1529 = vmatprep.mubr.f32.mxu1 %v3248_v46 }
 0x144   :  { %2706 = vmatmul.mubr.msk.f32.gmra.mrb[34].mxu0 %vm1249_vm2, %v4161_v7 }
 0x145   :  { %2722 = vmatmul.mubr.msk.f32.gmra.mrb[34].mxu1 %vm1249_vm2, %v4161_v7  ;;  %1374 = vmatprep.mubr.f32.mxu0 %v3248_v46 }
 0x146   :  { %1535 = vmatprep.mubr.f32.mxu1 %v3248_v46 }
 0x148   :  { %2707 = vmatmul.mubr.msk.f32.gmra.mrb[36].mxu0 %vm1249_vm2, %v4172_v20 }
 0x149   :  { %2723 = vmatmul.mubr.msk.f32.gmra.mrb[36].mxu1 %vm1249_vm2, %v4172_v20  ;;  %1380 = vmatprep.mubr.f32.mxu0 %v3248_v46 }
 0x14a   :  { %1541 = vmatprep.mubr.f32.mxu1 %v3248_v46 }
 0x14c   :  { %2708 = vmatmul.mubr.msk.f32.gmra.mrb[38].mxu0 %vm1249_vm2, %v4183_v36 }
 0x14d   :  { %2724 = vmatmul.mubr.msk.f32.gmra.mrb[38].mxu1 %vm1249_vm2, %v4183_v36  ;;  %1386 = vmatprep.mubr.f32.mxu0 %v3248_v46 }
 0x14e   :  { %1547 = vmatprep.mubr.f32.mxu1 %v3248_v46 }
 0x150   :  { %2709 = vmatmul.mubr.msk.f32.gmra.mrb[40].mxu0 %vm1249_vm2, %v4194_v63 }
 0x151   :  { %2725 = vmatmul.mubr.msk.f32.gmra.mrb[40].mxu1 %vm1249_vm2, %v4194_v63  ;;  %1392 = vmatprep.mubr.f32.mxu0 %v3248_v46 }
 0x152   :  { %1553 = vmatprep.mubr.f32.mxu1 %v3248_v46 }
 0x154   :  { %2710 = vmatmul.mubr.msk.f32.gmra.mrb[42].mxu0 %vm1249_vm2, %v4205_v0 }
 0x155   :  { %2726 = vmatmul.mubr.msk.f32.gmra.mrb[42].mxu1 %vm1249_vm2, %v4205_v0  ;;  %1398 = vmatprep.mubr.f32.mxu0 %v3248_v46 }
 0x156   :  { %1559 = vmatprep.mubr.f32.mxu1 %v3248_v46 }
 0x158   :  { %v913_v1 = vpop.f32.mrb[16].mxu0  ;;  %2711 = vmatmul.mubr.msk.f32.gmra.mrb[44].mxu0 %vm1249_vm2, %v4216_v53 }
 0x159   :  { %v1026_v2 = vpop.f32.mrb[16].mxu1  ;;  %2727 = vmatmul.mubr.msk.f32.gmra.mrb[44].mxu1 %vm1249_vm2, %v4216_v53  ;;  %v915_v5 = vpop.f32.mrb[17].mxu0  ;;  %1404 = vmatprep.mubr.f32.mxu0 %v3248_v46  ;;  %v914_v9 = vadd.f32 %v913_v1, %v4099_v3 }
 0x15a   :  { %v1028_v6 = vpop.f32.mrb[17].mxu1  ;;  %1565 = vmatprep.mubr.f32.mxu1 %v3248_v46  ;;  %v1027_v10 = vadd.f32 %v1026_v2, %v4099_v3  ;;  %v916_v11 = vadd.f32 %v915_v5, %v4099_v3 }
 0x15b   :  { %v1029_v12 = vadd.f32 %v1028_v6, %v4099_v3  ;;  %v4244_v3 = vld [vmem:[%s4818_s3 + $0x40] sm:$0xff]  ;;  %v1077_v22 = vmax.f32 %v914_v9, 0.0 }
 0x15c   :  { %v919_v13 = vpop.f32.mrb[18].mxu0  ;;  %2712 = vmatmul.mubr.msk.f32.gmra.mrb[46].mxu0 %vm1249_vm2, %v4227_v8  ;;  %v1079_v24 = vmax.f32 %v1027_v10, 0.0  ;;  %v1078_v27 = vmax.f32 %v916_v11, 0.0 }
 0x15d   :  { %v1032_v14 = vpop.f32.mrb[18].mxu1  ;;  %2728 = vmatmul.mubr.msk.f32.gmra.mrb[46].mxu1 %vm1249_vm2, %v4227_v8  ;;  %v920_v15 = vadd.f32 %v919_v13, %v4101_v39  ;;  %v921_v17 = vpop.f32.mrb[19].mxu0  ;;  %1410 = vmatprep.mubr.f32.mxu0 %v3248_v46  ;;  %v1080_v29 = vmax.f32 %v1029_v12, 0.0 }
 0x15e   :  { %v1033_v16 = vadd.f32 %v1032_v14, %v4101_v39  ;;  %v1034_v18 = vpop.f32.mrb[19].mxu1  ;;  %1571 = vmatprep.mubr.f32.mxu1 %v3248_v46  ;;  %v922_v19 = vadd.f32 %v921_v17, %v4101_v39 }
 0x15f   :  { %v1035_v21 = vadd.f32 %v1034_v18, %v4101_v39  ;;  %v1085_v25 = vmax.f32 %v920_v15, 0.0  ;;  %v4286_v15 = vld [vmem:[%s4818_s3 + $0x58] sm:$0xff] }
 0x160   :  { %v1087_v26 = vmax.f32 %v1033_v16, 0.0  ;;  %v1086_v30 = vmax.f32 %v922_v19, 0.0  ;;  %v925_v34 = vpop.f32.mrb[20].mxu0  ;;  %2713 = vmatmul.mubr.msk.f32.gmra.mrb[48].mxu0 %vm1249_vm2, %v4244_v3 }
 0x161   :  { %v1088_v33 = vmax.f32 %v1035_v21, 0.0  ;;  %v1038_v35 = vpop.f32.mrb[20].mxu1  ;;  %2729 = vmatmul.mubr.msk.f32.gmra.mrb[48].mxu1 %vm1249_vm2, %v4244_v3  ;;  %v3187_v37 = vpack.c.bf16 %v1085_v25, %v1077_v22  ;;  %v927_v40 = vpop.f32.mrb[21].mxu0  ;;  %1416 = vmatprep.mubr.f32.mxu0 %v3248_v46  ;;  %v926_v44 = vadd.f32 %v925_v34, %v4103_v62 }
 0x162   :  { %v3203_v38 = vpack.c.bf16 %v1087_v26, %v1079_v24  ;;  %v1040_v39 = vpop.f32.mrb[21].mxu1  ;;  %v3185_v42 = vpack.c.bf16 %v1086_v30, %v1078_v27  ;;  %1577 = vmatprep.mubr.f32.mxu1 %v3248_v46  ;;  %v1039_v45 = vadd.f32 %v1038_v35, %v4103_v62  ;;  %v928_v47 = vadd.f32 %v927_v40, %v4103_v62 }
 0x163   :  { %v3201_v43 = vpack.c.bf16 %v1088_v33, %v1080_v29  ;;  %v1041_v48 = vadd.f32 %v1040_v39, %v4103_v62  ;;  %v4272_v62 = vld [vmem:[%s4818_s3 + $0x50] sm:$0xff]  ;;  %v1093_v58 = vmax.f32 %v926_v44, 0.0 }
 0x164   :  { %v931_v49 = vpop.f32.mrb[22].mxu0  ;;  %2714 = vmatmul.mubr.msk.f32.gmra.mrb[50].mxu0 %vm1249_vm2, %v4256_v41  ;;  %3186 = vmatprep.subr.bf16.mxu0 %v3185_v42  ;;  %v1095_v59 = vmax.f32 %v1039_v45, 0.0  ;;  %v1094_v2 = vmax.f32 %v928_v47, 0.0 }
 0x165   :  { %v1044_v50 = vpop.f32.mrb[22].mxu1  ;;  %2730 = vmatmul.mubr.msk.f32.gmra.mrb[50].mxu1 %vm1249_vm2, %v4256_v41  ;;  %v932_v51 = vadd.f32 %v931_v49, %v4113_v31  ;;  %3202 = vmatprep.subr.bf16.mxu1 %v3201_v43  ;;  %v933_v54 = vpop.f32.mrb[23].mxu0  ;;  %v1096_v5 = vmax.f32 %v1041_v48, 0.0 }
 0x166   :  { %v1045_v52 = vadd.f32 %v1044_v50, %v4113_v31  ;;  %v1046_v55 = vpop.f32.mrb[23].mxu1  ;;  %v934_v56 = vadd.f32 %v933_v54, %v4113_v31  ;;  %3188 = vmatpush1.bf16.msra.mxu0 %v3187_v37  ;;  %3204 = vmatpush1.bf16.msra.mxu1 %v3203_v38 }
 0x167   :  { %v1047_v57 = vadd.f32 %v1046_v55, %v4113_v31  ;;  %v1101_v60 = vmax.f32 %v932_v51, 0.0  ;;  %1422 = vmatprep.mubr.f32.mxu0 %v3248_v46  ;;  %1583 = vmatprep.mubr.f32.mxu1 %v3248_v46  ;;  %v4316_v51 = vld [vmem:[%s4818_s3 + $0x68] sm:$0xff] }
 0x168   :  { %v1103_v1 = vmax.f32 %v1045_v52, 0.0  ;;  %v1102_v6 = vmax.f32 %v934_v56, 0.0  ;;  %v937_v10 = vpop.f32.mrb[24].mxu0  ;;  %2715 = vmatmul.mubr.msk.f32.gmra.mrb[52].mxu0 %vm1249_vm2, %v4272_v62 }
 0x169   :  { %v1104_v9 = vmax.f32 %v1047_v57, 0.0  ;;  %v1050_v11 = vpop.f32.mrb[24].mxu1  ;;  %2731 = vmatmul.mubr.msk.f32.gmra.mrb[52].mxu1 %vm1249_vm2, %v4272_v62  ;;  %v3191_v31 = vpack.c.bf16 %v1101_v60, %v1093_v58  ;;  %v939_v13 = vpop.f32.mrb[25].mxu0  ;;  %1428 = vmatprep.mubr.f32.mxu0 %v3248_v46  ;;  %v938_v18 = vadd.f32 %v937_v10, %v4123_v61 }
 0x16a   :  { %v3207_v12 = vpack.c.bf16 %v1103_v1, %v1095_v59  ;;  %v1052_v14 = vpop.f32.mrb[25].mxu1  ;;  %v3189_v16 = vpack.c.bf16 %v1102_v6, %v1094_v2  ;;  %1589 = vmatprep.mubr.f32.mxu1 %v3248_v46  ;;  %v1051_v19 = vadd.f32 %v1050_v11, %v4123_v61  ;;  %v940_v21 = vadd.f32 %v939_v13, %v4123_v61 }
 0x16b   :  { %v3205_v17 = vpack.c.bf16 %v1104_v9, %v1096_v5  ;;  %v1053_v22 = vadd.f32 %v1052_v14, %v4123_v61  ;;  %v4302_v61 = vld [vmem:[%s4818_s3 + $0x60] sm:$0xff]  ;;  %v1109_v35 = vmax.f32 %v938_v18, 0.0 }
 0x16c   :  { %v943_v24 = vpop.f32.mrb[26].mxu0  ;;  %2716 = vmatmul.mubr.msk.f32.gmra.mrb[54].mxu0 %vm1249_vm2, %v4286_v15  ;;  %3190 = vmatprep.subr.bf16.mxu0 %v3189_v16  ;;  %v1111_v37 = vmax.f32 %v1051_v19, 0.0  ;;  %v1110_v39 = vmax.f32 %v940_v21, 0.0  ;;  %v4347_v21 = vld [vmem:[%s4818_s3 + $0x78] sm:$0xff] }
 0x16d   :  { %v1056_v25 = vpop.f32.mrb[26].mxu1  ;;  %2732 = vmatmul.mubr.msk.f32.gmra.mrb[54].mxu1 %vm1249_vm2, %v4286_v15  ;;  %v944_v26 = vadd.f32 %v943_v24, %v4125_v23  ;;  %3206 = vmatprep.subr.bf16.mxu1 %v3205_v17  ;;  %v945_v29 = vpop.f32.mrb[27].mxu0  ;;  %v1112_v42 = vmax.f32 %v1053_v22, 0.0 }
 0x16e   :  { %v1057_v27 = vadd.f32 %v1056_v25, %v4125_v23  ;;  %v1058_v30 = vpop.f32.mrb[27].mxu1  ;;  %v946_v33 = vadd.f32 %v945_v29, %v4125_v23  ;;  %3192 = vmatpush1.bf16.msra.mxu0 %v3191_v31  ;;  %3208 = vmatpush1.bf16.msra.mxu1 %v3207_v12 }
 0x16f   :  { %v1059_v34 = vadd.f32 %v1058_v30, %v4125_v23  ;;  %v1117_v38 = vmax.f32 %v944_v26, 0.0  ;;  %1434 = vmatprep.mubr.f32.mxu0 %v3248_v46  ;;  %1595 = vmatprep.mubr.f32.mxu1 %v3248_v46 }
 0x170   :  { %v1119_v40 = vmax.f32 %v1057_v27, 0.0  ;;  %v1118_v43 = vmax.f32 %v946_v33, 0.0  ;;  %v949_v45 = vpop.f32.mrb[28].mxu0  ;;  %2717 = vmatmul.mubr.msk.f32.gmra.mrb[56].mxu0 %vm1249_vm2, %v4302_v61 }
 0x171   :  { %v1120_v44 = vmax.f32 %v1059_v34, 0.0  ;;  %v1062_v47 = vpop.f32.mrb[28].mxu1  ;;  %2733 = vmatmul.mubr.msk.f32.gmra.mrb[56].mxu1 %vm1249_vm2, %v4302_v61  ;;  %v3195_v23 = vpack.c.bf16 %v1117_v38, %v1109_v35  ;;  %v951_v49 = vpop.f32.mrb[29].mxu0  ;;  %1440 = vmatprep.mubr.f32.mxu0 %v3248_v46  ;;  %v950_v55 = vadd.f32 %v949_v45, %v4135_v28 }
 0x172   :  { %v3211_v48 = vpack.c.bf16 %v1119_v40, %v1111_v37  ;;  %v1064_v50 = vpop.f32.mrb[29].mxu1  ;;  %v3193_v52 = vpack.c.bf16 %v1118_v43, %v1110_v39  ;;  %1601 = vmatprep.mubr.f32.mxu1 %v3248_v46  ;;  %v1063_v56 = vadd.f32 %v1062_v47, %v4135_v28  ;;  %v952_v57 = vadd.f32 %v951_v49, %v4135_v28 }
 0x173   :  { %v3209_v54 = vpack.c.bf16 %v1120_v44, %v1112_v42  ;;  %v1065_v58 = vadd.f32 %v1064_v50, %v4135_v28  ;;  %v4332_v28 = vld [vmem:[%s4818_s3 + $0x70] sm:$0xff]  ;;  %v1125_v11 = vmax.f32 %v950_v55, 0.0 }
 0x174   :  { %v955_v59 = vpop.f32.mrb[30].mxu0  ;;  %2718 = vmatmul.mubr.msk.f32.gmra.mrb[58].mxu0 %vm1249_vm2, %v4316_v51  ;;  %3194 = vmatprep.subr.bf16.mxu0 %v3193_v52  ;;  %v1127_v31 = vmax.f32 %v1063_v56, 0.0  ;;  %v1126_v14 = vmax.f32 %v952_v57, 0.0  ;;  %v4493_v52 = vstv %s4821_s6  ;;  %s3250_s6 = smov [#allocation3]  }
 0x175   :  { %v1068_v60 = vpop.f32.mrb[30].mxu1  ;;  %2734 = vmatmul.mubr.msk.f32.gmra.mrb[58].mxu1 %vm1249_vm2, %v4316_v51  ;;  %v956_v1 = vadd.f32 %v955_v59, %v4137_v32  ;;  %3210 = vmatprep.subr.bf16.mxu1 %v3209_v54  ;;  %v957_v5 = vpop.f32.mrb[31].mxu0  ;;  %v1128_v16 = vmax.f32 %v1065_v58, 0.0  ;;  %4829 = vst [vmem:[#allocation6_spill] sm:$0xff] %v4493_v52  ;;  %s2537_s20 = sshll.u32 %s3250_s6, 4  ;;  %s2538_s20 = int_to_ptr.vmem [resolvable:$true] %s2537_s20 }
 0x176   :  { %v1069_v2 = vadd.f32 %v1068_v60, %v4137_v32  ;;  %v1070_v6 = vpop.f32.mrb[31].mxu1  ;;  %v958_v9 = vadd.f32 %v957_v5, %v4137_v32  ;;  %3196 = vmatpush1.bf16.msra.mxu0 %v3195_v23  ;;  %3212 = vmatpush1.bf16.msra.mxu1 %v3211_v48  ;;  %s3223_s21 = scalar_lea.vmem %s2538_s20, 128  ;;  %p3228_p1 = scmp.lt.s32.totalorder %s2538_s20, %s2538_s20 }
 0x177   :  { %v1071_v10 = vadd.f32 %v1070_v6, %v4137_v32  ;;  %v1133_v12 = vmax.f32 %v956_v1, 0.0  ;;  %1446 = vmatprep.mubr.f32.mxu0 %v3248_v46  ;;  %1607 = vmatprep.mubr.f32.mxu1 %v3248_v46  ;;  %p3224_p0 = scmp.ne.s32.totalorder %s2538_s20, %s3223_s21  ;;  %p3229_p2 = scmp.lt.s32.totalorder %s3223_s21, %s3223_s21 }
 0x178   :  { %v1135_v13 = vmax.f32 %v1069_v2, 0.0  ;;  %v1134_v17 = vmax.f32 %v958_v9, 0.0  ;;  %2719 = vmatmul.mubr.msk.f32.gmra.mrb[60].mxu0 %vm1249_vm2, %v4332_v28  ;;  %v3249_v9 = vmov 1966171168  }
 0x179   :  { %v1136_v18 = vmax.f32 %v1071_v10, 0.0  ;;  %2735 = vmatmul.mubr.msk.f32.gmra.mrb[60].mxu1 %vm1249_vm2, %v4332_v28  ;;  %v3199_v32 = vpack.c.bf16 %v1133_v12, %v1125_v11  ;;  %1452 = vmatprep.mubr.f32.mxu0 %v3248_v46  ;;  %v4502_v10 = vunpack.c.l.s4 %v3249_v9  ;;  %v2487_v11 = vlaneseq  ;;  %p3230_p3 = por %p3229_p2, %p3228_p1 }
 0x17a   :  { %v3215_v19 = vpack.c.bf16 %v1135_v13, %v1127_v31  ;;  %1613 = vmatprep.mubr.f32.mxu1 %v3248_v46  ;;  %v3197_v22 = vpack.c.bf16 %v1134_v17, %v1126_v14 }
 0x17b   :  { %v3213_v24 = vpack.c.bf16 %v1136_v18, %v1128_v16  ;;  %4830 = vst [vmem:[#allocation7_spill] sm:$0xff] %v4502_v10  ;;  %p3231_p4 = pnand %p3230_p3, %p3224_p0 }
 0x17c   :  { %2720 = vmatmul.mubr.msk.f32.gmra.mrb[62].mxu0 %vm1249_vm2, %v4347_v21  ;;  %3198 = vmatprep.subr.bf16.mxu0 %v3197_v22 }
 0x17d   :  { %2736 = vmatmul.mubr.msk.f32.gmra.mrb[62].mxu1 %vm1249_vm2, %v4347_v21  ;;  %3214 = vmatprep.subr.bf16.mxu1 %v3213_v24 }
 0x17e   :  { %3200 = vmatpush1.bf16.msra.mxu0 %v3199_v32  ;;  %3216 = vmatpush1.bf16.msra.mxu1 %v3215_v19 }
 0x17f   :  { %1684 = vmatprep.mubr.f32.mxu0 %v3248_v46  ;;  %1845 = vmatprep.mubr.f32.mxu1 %v3248_v46 }
 0x181   :  { %2737 = vmatmul.mubr.msk.f32.vlgmr.msra.gmra.mrb[64].mxu0 %vm1249_vm2, %v4150_v4  ;;  %2753 = vmatmul.mubr.msk.f32.vlgmr.msra.gmra.mrb[64].mxu1 %vm1249_vm2, %v4150_v4  ;;  %v4449_v4 = vpop.permute.xlu0 %1171 }
 0x182   :  { %1690 = vmatprep.mubr.f32.mxu0 %v3248_v46  ;;  %1851 = vmatprep.mubr.f32.mxu1 %v3248_v46 }
 0x185   :  { %2738 = vmatmul.mubr.msk.f32.gmra.mrb[66].mxu0 %vm1249_vm2, %v4161_v7  ;;  %2754 = vmatmul.mubr.msk.f32.gmra.mrb[66].mxu1 %vm1249_vm2, %v4161_v7  ;;  %v4451_v7 = vpop.permute.xlu1 %1176 }
 0x186   :  { %1696 = vmatprep.mubr.f32.mxu0 %v3248_v46  ;;  %1857 = vmatprep.mubr.f32.mxu1 %v3248_v46 }
 0x189   :  { %2739 = vmatmul.mubr.msk.f32.gmra.mrb[68].mxu0 %vm1249_vm2, %v4172_v20  ;;  %2755 = vmatmul.mubr.msk.f32.gmra.mrb[68].mxu1 %vm1249_vm2, %v4172_v20  ;;  %v4453_v20 = vpop.permute.xlu0 %1181 }
 0x18a   :  { %1702 = vmatprep.mubr.f32.mxu0 %v3248_v46  ;;  %1863 = vmatprep.mubr.f32.mxu1 %v3248_v46 }
 0x18d   :  { %2740 = vmatmul.mubr.msk.f32.gmra.mrb[70].mxu0 %vm1249_vm2, %v4183_v36  ;;  %2756 = vmatmul.mubr.msk.f32.gmra.mrb[70].mxu1 %vm1249_vm2, %v4183_v36  ;;  %v4455_v36 = vpop.permute.xlu1 %1186 }
 0x18e   :  { %1708 = vmatprep.mubr.f32.mxu0 %v3248_v46  ;;  %1869 = vmatprep.mubr.f32.mxu1 %v3248_v46 }
 0x191   :  { %2741 = vmatmul.mubr.msk.f32.gmra.mrb[72].mxu0 %vm1249_vm2, %v4194_v63  ;;  %2757 = vmatmul.mubr.msk.f32.gmra.mrb[72].mxu1 %vm1249_vm2, %v4194_v63  ;;  %v4457_v63 = vpop.permute.xlu0 %2088 }
 0x192   :  { %1714 = vmatprep.mubr.f32.mxu0 %v3248_v46  ;;  %1875 = vmatprep.mubr.f32.mxu1 %v3248_v46 }
 0x195   :  { %2742 = vmatmul.mubr.msk.f32.gmra.mrb[74].mxu0 %vm1249_vm2, %v4205_v0  ;;  %2758 = vmatmul.mubr.msk.f32.gmra.mrb[74].mxu1 %vm1249_vm2, %v4205_v0  ;;  %v4459_v0 = vpop.permute.xlu1 %2093 }
 0x196   :  { %1720 = vmatprep.mubr.f32.mxu0 %v3248_v46  ;;  %1881 = vmatprep.mubr.f32.mxu1 %v3248_v46 }
 0x199   :  { %2743 = vmatmul.mubr.msk.f32.gmra.mrb[76].mxu0 %vm1249_vm2, %v4216_v53  ;;  %2759 = vmatmul.mubr.msk.f32.gmra.mrb[76].mxu1 %vm1249_vm2, %v4216_v53  ;;  %v4461_v53 = vpop.permute.xlu0 %1191 }
 0x19a   :  { %1726 = vmatprep.mubr.f32.mxu0 %v3248_v46  ;;  %1887 = vmatprep.mubr.f32.mxu1 %v3248_v46 }
 0x19d   :  { %2744 = vmatmul.mubr.msk.f32.gmra.mrb[78].mxu0 %vm1249_vm2, %v4227_v8  ;;  %2760 = vmatmul.mubr.msk.f32.gmra.mrb[78].mxu1 %vm1249_vm2, %v4227_v8  ;;  %v4465_v8 = vpop.permute.xlu0 %1196 }
 0x19e   :  { %1732 = vmatprep.mubr.f32.mxu0 %v3248_v46  ;;  %1893 = vmatprep.mubr.f32.mxu1 %v3248_v46 }
 0x1a1   :  { %2745 = vmatmul.mubr.msk.f32.gmra.mrb[80].mxu0 %vm1249_vm2, %v4244_v3  ;;  %2761 = vmatmul.mubr.msk.f32.gmra.mrb[80].mxu1 %vm1249_vm2, %v4244_v3 }
 0x1a2   :  { %1738 = vmatprep.mubr.f32.mxu0 %v3248_v46  ;;  %1899 = vmatprep.mubr.f32.mxu1 %v3248_v46 }
 0x1a5   :  { %2746 = vmatmul.mubr.msk.f32.gmra.mrb[82].mxu0 %vm1249_vm2, %v4256_v41  ;;  %2762 = vmatmul.mubr.msk.f32.gmra.mrb[82].mxu1 %vm1249_vm2, %v4256_v41  ;;  %v4469_v41 = vpop.permute.xlu0 %1201 }
 0x1a6   :  { %1744 = vmatprep.mubr.f32.mxu0 %v3248_v46  ;;  %1905 = vmatprep.mubr.f32.mxu1 %v3248_v46 }
 0x1a9   :  { %2747 = vmatmul.mubr.msk.f32.gmra.mrb[84].mxu0 %vm1249_vm2, %v4272_v62  ;;  %2763 = vmatmul.mubr.msk.f32.gmra.mrb[84].mxu1 %vm1249_vm2, %v4272_v62 }
 0x1aa   :  { %1750 = vmatprep.mubr.f32.mxu0 %v3248_v46  ;;  %1911 = vmatprep.mubr.f32.mxu1 %v3248_v46 }
 0x1ad   :  { %2748 = vmatmul.mubr.msk.f32.gmra.mrb[86].mxu0 %vm1249_vm2, %v4286_v15  ;;  %2764 = vmatmul.mubr.msk.f32.gmra.mrb[86].mxu1 %vm1249_vm2, %v4286_v15  ;;  %v4473_v15 = vpop.permute.xlu0 %1206 }
 0x1ae   :  { %1756 = vmatprep.mubr.f32.mxu0 %v3248_v46  ;;  %1917 = vmatprep.mubr.f32.mxu1 %v3248_v46 }
 0x1b1   :  { %2749 = vmatmul.mubr.msk.f32.gmra.mrb[88].mxu0 %vm1249_vm2, %v4302_v61  ;;  %2765 = vmatmul.mubr.msk.f32.gmra.mrb[88].mxu1 %vm1249_vm2, %v4302_v61  ;;  %v4477_v26 = vpop.permute.xlu0 %1211 }
 0x1b2   :  { %1762 = vmatprep.mubr.f32.mxu0 %v3248_v46  ;;  %1923 = vmatprep.mubr.f32.mxu1 %v3248_v46 }
 0x1b5   :  { %2750 = vmatmul.mubr.msk.f32.gmra.mrb[90].mxu0 %vm1249_vm2, %v4316_v51  ;;  %2766 = vmatmul.mubr.msk.f32.gmra.mrb[90].mxu1 %vm1249_vm2, %v4316_v51  ;;  %v4485_v40 = vpop.permute.xlu0 %1216 }
 0x1b6   :  { %1768 = vmatprep.mubr.f32.mxu0 %v3248_v46  ;;  %1929 = vmatprep.mubr.f32.mxu1 %v3248_v46 }
 0x1b9   :  { %2751 = vmatmul.mubr.msk.f32.gmra.mrb[92].mxu0 %vm1249_vm2, %v4332_v28  ;;  %2767 = vmatmul.mubr.msk.f32.gmra.mrb[92].mxu1 %vm1249_vm2, %v4332_v28  ;;  %v4512_v22 = vpop.permute.xlu0 %1221 }
 0x1ba   :  { %1774 = vmatprep.mubr.f32.mxu0 %v3248_v46  ;;  %1935 = vmatprep.mubr.f32.mxu1 %v3248_v46  ;;  %v4463_v46 = vpop.permute.xlu1 %2098 }
 0x1bd   :  { %2752 = vmatmul.mubr.msk.f32.gmra.mrb[94].mxu0 %vm1249_vm2, %v4347_v21  ;;  %2768 = vmatmul.mubr.msk.f32.gmra.mrb[94].mxu1 %vm1249_vm2, %v4347_v21 }
 0x1be   :  { %v4467_v3 = vpop.permute.xlu1 %2103 }
 0x1c2   :  { %v4471_v62 = vpop.permute.xlu1 %2108 }
 0x1c6   :  { %v4475_v25 = vpop.permute.xlu1 %2113 }
 0x1ca   :  { %v4479_v27 = vpop.permute.xlu1 %2118 }
 0x1ce   :  { %v4499_v58 = vpop.permute.xlu1 %2123 }
 0x213   :  { %v1364_v29 = vpop.f32.mrb[32].mxu0 }
 0x214   :  { %v1525_v30 = vpop.f32.mrb[32].mxu1  ;;  %v1365_v61 = vadd.f32 %v1364_v29, %v4449_v4  ;;  %v1366_v34 = vpop.f32.mrb[33].mxu0 }
 0x215   :  { %v1526_v33 = vadd.f32 %v1525_v30, %v4449_v4  ;;  %v1527_v35 = vpop.f32.mrb[33].mxu1  ;;  %v1367_v37 = vadd.f32 %v1366_v34, %v4449_v4 }
 0x216   :  { %v1528_v38 = vadd.f32 %v1527_v35, %v4449_v4  ;;  %v1942_v39 = vmax.f32 %v1365_v61, 0.0 }
 0x217   :  { %v1944_v42 = vmax.f32 %v1526_v33, 0.0  ;;  %v1943_v43 = vmax.f32 %v1367_v37, 0.0  ;;  %v1370_v45 = vpop.f32.mrb[34].mxu0 }
 0x218   :  { %v1945_v44 = vmax.f32 %v1528_v38, 0.0  ;;  %v1531_v47 = vpop.f32.mrb[34].mxu1  ;;  %v2166_v23 = vmul.f32 %v4457_v63, %v1942_v39  ;;  %v1371_v48 = vadd.f32 %v1370_v45, %v4451_v7  ;;  %v1372_v50 = vpop.f32.mrb[35].mxu0 }
 0x219   :  { %v1532_v49 = vadd.f32 %v1531_v47, %v4451_v7  ;;  %v1533_v51 = vpop.f32.mrb[35].mxu1  ;;  %v2168_v54 = vmul.f32 %v4457_v63, %v1944_v42  ;;  %v2167_v55 = vmul.f32 %v4457_v63, %v1943_v43  ;;  %v1373_v56 = vadd.f32 %v1372_v50, %v4451_v7 }
 0x21a   :  { %v1534_v57 = vadd.f32 %v1533_v51, %v4451_v7  ;;  %v2169_v59 = vmul.f32 %v4457_v63, %v1945_v44  ;;  %v1950_v60 = vmax.f32 %v1371_v48, 0.0 }
 0x21b   :  { %v1952_v1 = vmax.f32 %v1532_v49, 0.0  ;;  %v1951_v2 = vmax.f32 %v1373_v56, 0.0  ;;  %v1376_v6 = vpop.f32.mrb[36].mxu0 }
 0x21c   :  { %v1953_v5 = vmax.f32 %v1534_v57, 0.0  ;;  %v1537_v28 = vpop.f32.mrb[36].mxu1  ;;  %v2174_v31 = vmul.f32 %v4459_v0, %v1950_v60  ;;  %v1377_v13 = vadd.f32 %v1376_v6, %v4453_v20  ;;  %v1378_v16 = vpop.f32.mrb[37].mxu0 }
 0x21d   :  { %v2176_v12 = vmul.f32 %v4459_v0, %v1952_v1  ;;  %v1538_v14 = vadd.f32 %v1537_v28, %v4453_v20  ;;  %v1539_v17 = vpop.f32.mrb[37].mxu1  ;;  %v2175_v18 = vmul.f32 %v4459_v0, %v1951_v2  ;;  %v1379_v19 = vadd.f32 %v1378_v16, %v4453_v20 }
 0x21e   :  { %v2177_v32 = vmul.f32 %v4459_v0, %v1953_v5  ;;  %v1540_v21 = vadd.f32 %v1539_v17, %v4453_v20  ;;  %v2294_v24 = vadd.f32 %v2174_v31, %v2166_v23  ;;  %v1958_v30 = vmax.f32 %v1377_v13, 0.0 }
 0x21f   :  { %v2336_v29 = vadd.f32 %v2176_v12, %v2168_v54  ;;  %v1960_v61 = vmax.f32 %v1538_v14, 0.0  ;;  %v2315_v33 = vadd.f32 %v2175_v18, %v2167_v55  ;;  %v1959_v35 = vmax.f32 %v1379_v19, 0.0  ;;  %v1382_v38 = vpop.f32.mrb[38].mxu0  ;;  %v4522_v54 = vpop.permute.xlu1 %2128 }
 0x220   :  { %v2357_v34 = vadd.f32 %v2177_v32, %v2169_v59  ;;  %v1961_v37 = vmax.f32 %v1540_v21, 0.0  ;;  %v1543_v39 = vpop.f32.mrb[38].mxu1  ;;  %v2182_v42 = vmul.f32 %v4463_v46, %v1958_v30  ;;  %v1383_v44 = vadd.f32 %v1382_v38, %v4455_v36  ;;  %v1384_v47 = vpop.f32.mrb[39].mxu0 }
 0x221   :  { %v2184_v43 = vmul.f32 %v4463_v46, %v1960_v61  ;;  %v1544_v45 = vadd.f32 %v1543_v39, %v4455_v36  ;;  %v1545_v48 = vpop.f32.mrb[39].mxu1  ;;  %v2183_v23 = vmul.f32 %v4463_v46, %v1959_v35  ;;  %v1385_v50 = vadd.f32 %v1384_v47, %v4455_v36  ;;  %v4532_v21 = vpop.permute.xlu0 %1226 }
 0x222   :  { %v2185_v49 = vmul.f32 %v4463_v46, %v1961_v37  ;;  %v1546_v51 = vadd.f32 %v1545_v48, %v4455_v36  ;;  %v2295_v55 = vadd.f32 %v2294_v24, %v2182_v42  ;;  %v1966_v57 = vmax.f32 %v1383_v44, 0.0 }
 0x223   :  { %v2337_v56 = vadd.f32 %v2336_v29, %v2184_v43  ;;  %v1968_v59 = vmax.f32 %v1544_v45, 0.0  ;;  %v2316_v60 = vadd.f32 %v2315_v33, %v2183_v23  ;;  %v1967_v2 = vmax.f32 %v1385_v50, 0.0  ;;  %v1388_v6 = vpop.f32.mrb[40].mxu0 }
 0x224   :  { %v2358_v1 = vadd.f32 %v2357_v34, %v2185_v49  ;;  %v1969_v5 = vmax.f32 %v1546_v51, 0.0  ;;  %v1549_v28 = vpop.f32.mrb[40].mxu1  ;;  %v2190_v9 = vmul.f32 %v4467_v3, %v1966_v57  ;;  %v1389_v12 = vadd.f32 %v1388_v6, %v4461_v53  ;;  %v1390_v14 = vpop.f32.mrb[41].mxu0 }
 0x225   :  { %v2192_v31 = vmul.f32 %v4467_v3, %v1968_v59  ;;  %v1550_v13 = vadd.f32 %v1549_v28, %v4461_v53  ;;  %v1551_v16 = vpop.f32.mrb[41].mxu1  ;;  %v2191_v17 = vmul.f32 %v4467_v3, %v1967_v2  ;;  %v1391_v32 = vadd.f32 %v1390_v14, %v4461_v53 }
 0x226   :  { %v2193_v18 = vmul.f32 %v4467_v3, %v1969_v5  ;;  %v1552_v19 = vadd.f32 %v1551_v16, %v4461_v53  ;;  %v2296_v24 = vadd.f32 %v2295_v55, %v2190_v9  ;;  %v1974_v30 = vmax.f32 %v1389_v12, 0.0  ;;  %v4542_v55 = vpop.permute.xlu1 %2133 }
 0x227   :  { %v2338_v29 = vadd.f32 %v2337_v56, %v2192_v31  ;;  %v1976_v61 = vmax.f32 %v1550_v13, 0.0  ;;  %v2317_v33 = vadd.f32 %v2316_v60, %v2191_v17  ;;  %v1975_v35 = vmax.f32 %v1391_v32, 0.0  ;;  %v1394_v38 = vpop.f32.mrb[42].mxu0 }
 0x228   :  { %v2359_v34 = vadd.f32 %v2358_v1, %v2193_v18  ;;  %v1977_v37 = vmax.f32 %v1552_v19, 0.0  ;;  %v1555_v39 = vpop.f32.mrb[42].mxu1  ;;  %v2198_v42 = vmul.f32 %v4471_v62, %v1974_v30  ;;  %v1395_v44 = vadd.f32 %v1394_v38, %v4465_v8  ;;  %v1396_v47 = vpop.f32.mrb[43].mxu0 }
 0x229   :  { %v2200_v43 = vmul.f32 %v4471_v62, %v1976_v61  ;;  %v1556_v45 = vadd.f32 %v1555_v39, %v4465_v8  ;;  %v1557_v48 = vpop.f32.mrb[43].mxu1  ;;  %v2199_v23 = vmul.f32 %v4471_v62, %v1975_v35  ;;  %v1397_v50 = vadd.f32 %v1396_v47, %v4465_v8 }
 0x22a   :  { %v2201_v49 = vmul.f32 %v4471_v62, %v1977_v37  ;;  %v1558_v51 = vadd.f32 %v1557_v48, %v4465_v8  ;;  %v2297_v56 = vadd.f32 %v2296_v24, %v2198_v42  ;;  %v1982_v59 = vmax.f32 %v1395_v44, 0.0 }
 0x22b   :  { %v2339_v57 = vadd.f32 %v2338_v29, %v2200_v43  ;;  %v1984_v60 = vmax.f32 %v1556_v45, 0.0  ;;  %v2318_v1 = vadd.f32 %v2317_v33, %v2199_v23  ;;  %v1983_v5 = vmax.f32 %v1397_v50, 0.0  ;;  %v1400_v28 = vpop.f32.mrb[44].mxu0  ;;  %v4552_v29 = vpop.permute.xlu0 %1231 }
 0x22c   :  { %v2360_v2 = vadd.f32 %v2359_v34, %v2201_v49  ;;  %v1985_v6 = vmax.f32 %v1558_v51, 0.0  ;;  %v1561_v9 = vpop.f32.mrb[44].mxu1  ;;  %v2206_v31 = vmul.f32 %v4475_v25, %v1982_v59  ;;  %v1401_v13 = vadd.f32 %v1400_v28, %v4469_v41  ;;  %v1402_v16 = vpop.f32.mrb[45].mxu0 }
 0x22d   :  { %v2208_v12 = vmul.f32 %v4475_v25, %v1984_v60  ;;  %v1562_v14 = vadd.f32 %v1561_v9, %v4469_v41  ;;  %v1563_v17 = vpop.f32.mrb[45].mxu1  ;;  %v2207_v18 = vmul.f32 %v4475_v25, %v1983_v5  ;;  %v1403_v19 = vadd.f32 %v1402_v16, %v4469_v41  ;;  %v4562_v59 = vpop.permute.xlu1 %2138 }
 0x22e   :  { %v2209_v32 = vmul.f32 %v4475_v25, %v1985_v6  ;;  %v1564_v24 = vadd.f32 %v1563_v17, %v4469_v41  ;;  %v2298_v30 = vadd.f32 %v2297_v56, %v2206_v31  ;;  %v1990_v33 = vmax.f32 %v1401_v13, 0.0 }
 0x22f   :  { %v2340_v61 = vadd.f32 %v2339_v57, %v2208_v12  ;;  %v1992_v34 = vmax.f32 %v1562_v14, 0.0  ;;  %v2319_v35 = vadd.f32 %v2318_v1, %v2207_v18  ;;  %v1991_v38 = vmax.f32 %v1403_v19, 0.0  ;;  %v1406_v42 = vpop.f32.mrb[46].mxu0 }
 0x230   :  { %v2361_v37 = vadd.f32 %v2360_v2, %v2209_v32  ;;  %v1993_v39 = vmax.f32 %v1564_v24, 0.0  ;;  %v1567_v43 = vpop.f32.mrb[46].mxu1  ;;  %v2214_v44 = vmul.f32 %v4479_v27, %v1990_v33  ;;  %v1407_v47 = vadd.f32 %v1406_v42, %v4473_v15  ;;  %v1408_v23 = vpop.f32.mrb[47].mxu0 }
 0x231   :  { %v2216_v45 = vmul.f32 %v4479_v27, %v1992_v34  ;;  %v1568_v48 = vadd.f32 %v1567_v43, %v4473_v15  ;;  %v1569_v49 = vpop.f32.mrb[47].mxu1  ;;  %v2215_v50 = vmul.f32 %v4479_v27, %v1991_v38  ;;  %v1409_v56 = vadd.f32 %v1408_v23, %v4473_v15  ;;  %v4572_v34 = vpop.permute.xlu0 %1236 }
 0x232   :  { %v2217_v51 = vmul.f32 %v4479_v27, %v1993_v39  ;;  %v1570_v57 = vadd.f32 %v1569_v49, %v4473_v15  ;;  %v2299_v60 = vadd.f32 %v2298_v30, %v2214_v44  ;;  %v1998_v2 = vmax.f32 %v1407_v47, 0.0 }
 0x233   :  { %v2341_v1 = vadd.f32 %v2340_v61, %v2216_v45  ;;  %v2000_v5 = vmax.f32 %v1568_v48, 0.0  ;;  %v2320_v6 = vadd.f32 %v2319_v35, %v2215_v50  ;;  %v1999_v9 = vmax.f32 %v1409_v56, 0.0  ;;  %v1412_v12 = vpop.f32.mrb[48].mxu0 }
 0x234   :  { %v2362_v28 = vadd.f32 %v2361_v37, %v2217_v51  ;;  %v2001_v31 = vmax.f32 %v1570_v57, 0.0  ;;  %v1573_v13 = vpop.f32.mrb[48].mxu1  ;;  %v2222_v14 = vmul.f32 %v4499_v58, %v1998_v2  ;;  %v1413_v17 = vadd.f32 %v1412_v12, %v4477_v26  ;;  %v1414_v32 = vpop.f32.mrb[49].mxu0 }
 0x235   :  { %v2224_v16 = vmul.f32 %v4499_v58, %v2000_v5  ;;  %v1574_v18 = vadd.f32 %v1573_v13, %v4477_v26  ;;  %v1575_v19 = vpop.f32.mrb[49].mxu1  ;;  %v2223_v24 = vmul.f32 %v4499_v58, %v1999_v9  ;;  %v1415_v61 = vadd.f32 %v1414_v32, %v4477_v26 }
 0x236   :  { %v2225_v30 = vmul.f32 %v4499_v58, %v2001_v31  ;;  %v1576_v33 = vadd.f32 %v1575_v19, %v4477_v26  ;;  %v2300_v35 = vadd.f32 %v2299_v60, %v2222_v14  ;;  %v2006_v38 = vmax.f32 %v1413_v17, 0.0 }
 0x237   :  { %v2342_v37 = vadd.f32 %v2341_v1, %v2224_v16  ;;  %v2008_v39 = vmax.f32 %v1574_v18, 0.0  ;;  %v2321_v42 = vadd.f32 %v2320_v6, %v2223_v24  ;;  %v2007_v44 = vmax.f32 %v1415_v61, 0.0  ;;  %v1418_v47 = vpop.f32.mrb[50].mxu0  ;;  %v4582_v6 = vpop.permute.xlu1 %2143 }
 0x238   :  { %v2363_v43 = vadd.f32 %v2362_v28, %v2225_v30  ;;  %v2009_v45 = vmax.f32 %v1576_v33, 0.0  ;;  %v1579_v48 = vpop.f32.mrb[50].mxu1  ;;  %v2230_v23 = vmul.f32 %v4522_v54, %v2006_v38  ;;  %v1419_v50 = vadd.f32 %v1418_v47, %v4485_v40  ;;  %v1420_v56 = vpop.f32.mrb[51].mxu0 }
 0x239   :  { %v2232_v49 = vmul.f32 %v4522_v54, %v2008_v39  ;;  %v1580_v51 = vadd.f32 %v1579_v48, %v4485_v40  ;;  %v1581_v57 = vpop.f32.mrb[51].mxu1  ;;  %v2231_v60 = vmul.f32 %v4522_v54, %v2007_v44  ;;  %v1421_v2 = vadd.f32 %v1420_v56, %v4485_v40 }
 0x23a   :  { %v2233_v1 = vmul.f32 %v4522_v54, %v2009_v45  ;;  %v1582_v5 = vadd.f32 %v1581_v57, %v4485_v40  ;;  %v2301_v28 = vadd.f32 %v2300_v35, %v2230_v23  ;;  %v2014_v31 = vmax.f32 %v1419_v50, 0.0 }
 0x23b   :  { %v2343_v9 = vadd.f32 %v2342_v37, %v2232_v49  ;;  %v2016_v12 = vmax.f32 %v1580_v51, 0.0  ;;  %v2322_v13 = vadd.f32 %v2321_v42, %v2231_v60  ;;  %v2015_v16 = vmax.f32 %v1421_v2, 0.0  ;;  %v1424_v18 = vpop.f32.mrb[52].mxu0 }
 0x23c   :  { %v2364_v14 = vadd.f32 %v2363_v43, %v2233_v1  ;;  %v2017_v17 = vmax.f32 %v1582_v5, 0.0  ;;  %v1585_v32 = vpop.f32.mrb[52].mxu1  ;;  %v2238_v19 = vmul.f32 %v4542_v55, %v2014_v31  ;;  %v1425_v30 = vadd.f32 %v1424_v18, %v4512_v22  ;;  %v1426_v33 = vpop.f32.mrb[53].mxu0 }
 0x23d   :  { %v2240_v24 = vmul.f32 %v4542_v55, %v2016_v12  ;;  %v1586_v61 = vadd.f32 %v1585_v32, %v4512_v22  ;;  %v1587_v38 = vpop.f32.mrb[53].mxu1  ;;  %v2239_v35 = vmul.f32 %v4542_v55, %v2015_v16  ;;  %v1427_v39 = vadd.f32 %v1426_v33, %v4512_v22  ;;  %v4592_v43 = vpop.permute.xlu0 %1241 }
 0x23e   :  { %v2241_v37 = vmul.f32 %v4542_v55, %v2017_v17  ;;  %v1588_v42 = vadd.f32 %v1587_v38, %v4512_v22  ;;  %v2302_v44 = vadd.f32 %v2301_v28, %v2238_v19  ;;  %v2022_v47 = vmax.f32 %v1425_v30, 0.0  ;;  %v4602_v16 = vpop.permute.xlu1 %2148 }
 0x23f   :  { %v2344_v45 = vadd.f32 %v2343_v9, %v2240_v24  ;;  %v2024_v48 = vmax.f32 %v1586_v61, 0.0  ;;  %v2323_v23 = vadd.f32 %v2322_v13, %v2239_v35  ;;  %v2023_v50 = vmax.f32 %v1427_v39, 0.0  ;;  %v1430_v56 = vpop.f32.mrb[54].mxu0 }
 0x240   :  { %v2365_v49 = vadd.f32 %v2364_v14, %v2241_v37  ;;  %v2025_v51 = vmax.f32 %v1588_v42, 0.0  ;;  %v1591_v57 = vpop.f32.mrb[54].mxu1  ;;  %v2246_v60 = vmul.f32 %v4562_v59, %v2022_v47  ;;  %v1431_v2 = vadd.f32 %v1430_v56, %v4532_v21  ;;  %v1432_v31 = vpop.f32.mrb[55].mxu0 }
 0x241   :  { %v2248_v1 = vmul.f32 %v4562_v59, %v2024_v48  ;;  %v1592_v5 = vadd.f32 %v1591_v57, %v4532_v21  ;;  %v1593_v12 = vpop.f32.mrb[55].mxu1  ;;  %v2247_v28 = vmul.f32 %v4562_v59, %v2023_v50  ;;  %v1433_v13 = vadd.f32 %v1432_v31, %v4532_v21 }
 0x242   :  { %v2249_v9 = vmul.f32 %v4562_v59, %v2025_v51  ;;  %v1594_v14 = vadd.f32 %v1593_v12, %v4532_v21  ;;  %v2303_v17 = vadd.f32 %v2302_v44, %v2246_v60  ;;  %v2030_v32 = vmax.f32 %v1431_v2, 0.0  ;;  %v4612_v51 = vpop.permute.xlu0 %1246 }
 0x243   :  { %v2345_v18 = vadd.f32 %v2344_v45, %v2248_v1  ;;  %v2032_v19 = vmax.f32 %v1592_v5, 0.0  ;;  %v2324_v24 = vadd.f32 %v2323_v23, %v2247_v28  ;;  %v2031_v61 = vmax.f32 %v1433_v13, 0.0  ;;  %v1436_v38 = vpop.f32.mrb[56].mxu0 }
 0x244   :  { %v2366_v30 = vadd.f32 %v2365_v49, %v2249_v9  ;;  %v2033_v33 = vmax.f32 %v1594_v14, 0.0  ;;  %v1597_v35 = vpop.f32.mrb[56].mxu1  ;;  %v2254_v37 = vmul.f32 %v4582_v6, %v2030_v32  ;;  %v1437_v42 = vadd.f32 %v1436_v38, %v4552_v29  ;;  %v1438_v48 = vpop.f32.mrb[57].mxu0 }
 0x245   :  { %v2256_v39 = vmul.f32 %v4582_v6, %v2032_v19  ;;  %v1598_v47 = vadd.f32 %v1597_v35, %v4552_v29  ;;  %v1599_v50 = vpop.f32.mrb[57].mxu1  ;;  %v2255_v44 = vmul.f32 %v4582_v6, %v2031_v61  ;;  %v1439_v23 = vadd.f32 %v1438_v48, %v4552_v29  ;;  %v4622_v38 = vpop.permute.xlu1 %2153 }
 0x246   :  { %v2257_v45 = vmul.f32 %v4582_v6, %v2033_v33  ;;  %v1600_v49 = vadd.f32 %v1599_v50, %v4552_v29  ;;  %v2304_v56 = vadd.f32 %v2303_v17, %v2254_v37  ;;  %v2038_v60 = vmax.f32 %v1437_v42, 0.0 }
 0x247   :  { %v2346_v57 = vadd.f32 %v2345_v18, %v2256_v39  ;;  %v2040_v1 = vmax.f32 %v1598_v47, 0.0  ;;  %v2325_v2 = vadd.f32 %v2324_v24, %v2255_v44  ;;  %v2039_v31 = vmax.f32 %v1439_v23, 0.0  ;;  %v1442_v28 = vpop.f32.mrb[58].mxu0 }
 0x248   :  { %v2367_v5 = vadd.f32 %v2366_v30, %v2257_v45  ;;  %v2041_v12 = vmax.f32 %v1600_v49, 0.0  ;;  %v1603_v9 = vpop.f32.mrb[58].mxu1  ;;  %v2262_v13 = vmul.f32 %v4602_v16, %v2038_v60  ;;  %v1443_v32 = vadd.f32 %v1442_v28, %v4572_v34  ;;  %v1444_v61 = vpop.f32.mrb[59].mxu0 }
 0x249   :  { %v2264_v14 = vmul.f32 %v4602_v16, %v2040_v1  ;;  %v1604_v19 = vadd.f32 %v1603_v9, %v4572_v34  ;;  %v1605_v33 = vpop.f32.mrb[59].mxu1  ;;  %v2263_v17 = vmul.f32 %v4602_v16, %v2039_v31  ;;  %v1445_v24 = vadd.f32 %v1444_v61, %v4572_v34  ;;  %v4632_v9 = vpop.permute.xlu0 %2158 }
 0x24a   :  { %v2265_v18 = vmul.f32 %v4602_v16, %v2041_v12  ;;  %v1606_v30 = vadd.f32 %v1605_v33, %v4572_v34  ;;  %v2305_v35 = vadd.f32 %v2304_v56, %v2262_v13  ;;  %v2046_v39 = vmax.f32 %v1443_v32, 0.0 }
 0x24b   :  { %v2347_v37 = vadd.f32 %v2346_v57, %v2264_v14  ;;  %v2048_v42 = vmax.f32 %v1604_v19, 0.0  ;;  %v2326_v47 = vadd.f32 %v2325_v2, %v2263_v17  ;;  %v2047_v50 = vmax.f32 %v1445_v24, 0.0  ;;  %v1448_v45 = vpop.f32.mrb[60].mxu0 }
 0x24c   :  { %v2368_v48 = vadd.f32 %v2367_v5, %v2265_v18  ;;  %v2049_v44 = vmax.f32 %v1606_v30, 0.0  ;;  %v1609_v23 = vpop.f32.mrb[60].mxu1  ;;  %v2270_v49 = vmul.f32 %v4622_v38, %v2046_v39  ;;  %v1449_v1 = vadd.f32 %v1448_v45, %v4592_v43  ;;  %v1450_v12 = vpop.f32.mrb[61].mxu0 }
 0x24d   :  { %v2272_v60 = vmul.f32 %v4622_v38, %v2048_v42  ;;  %v1610_v31 = vadd.f32 %v1609_v23, %v4592_v43  ;;  %v1611_v28 = vpop.f32.mrb[61].mxu1  ;;  %v2271_v56 = vmul.f32 %v4622_v38, %v2047_v50  ;;  %v1451_v2 = vadd.f32 %v1450_v12, %v4592_v43  ;;  %v4642_v12 = vpop.permute.xlu1 %2163 }
 0x24e   :  { %v2273_v57 = vmul.f32 %v4622_v38, %v2049_v44  ;;  %v1612_v5 = vadd.f32 %v1611_v28, %v4592_v43  ;;  %v2306_v13 = vadd.f32 %v2305_v35, %v2270_v49  ;;  %v2054_v32 = vmax.f32 %v1449_v1, 0.0  ;;  %4831 = vst [vmem:[#allocation8_spill] sm:$0xff] %v4642_v12 }
 0x24f   :  { %v2348_v14 = vadd.f32 %v2347_v37, %v2272_v60  ;;  %v2056_v19 = vmax.f32 %v1610_v31, 0.0  ;;  %v2327_v61 = vadd.f32 %v2326_v47, %v2271_v56  ;;  %v2055_v17 = vmax.f32 %v1451_v2, 0.0  ;;  %v1454_v24 = vpop.f32.mrb[62].mxu0 }
 0x250   :  { %v2369_v33 = vadd.f32 %v2368_v48, %v2273_v57  ;;  %v2057_v18 = vmax.f32 %v1612_v5, 0.0  ;;  %v1615_v30 = vpop.f32.mrb[62].mxu1  ;;  %v2278_v39 = vmul.f32 %v4632_v9, %v2054_v32  ;;  %v1455_v50 = vadd.f32 %v1454_v24, %v4612_v51  ;;  %v1456_v45 = vpop.f32.mrb[63].mxu0 }
 0x251   :  { %v2280_v42 = vmul.f32 %v4632_v9, %v2056_v19  ;;  %v1616_v44 = vadd.f32 %v1615_v30, %v4612_v51  ;;  %v1617_v23 = vpop.f32.mrb[63].mxu1  ;;  %v2279_v35 = vmul.f32 %v4632_v9, %v2055_v17  ;;  %v1457_v47 = vadd.f32 %v1456_v45, %v4612_v51 }
 0x252   :  { %v2281_v37 = vmul.f32 %v4632_v9, %v2057_v18  ;;  %v1618_v48 = vadd.f32 %v1617_v23, %v4612_v51  ;;  %v2307_v49 = vadd.f32 %v2306_v13, %v2278_v39  ;;  %v2062_v1 = vmax.f32 %v1455_v50, 0.0 }
 0x253   :  { %v2349_v60 = vadd.f32 %v2348_v14, %v2280_v42  ;;  %v2064_v31 = vmax.f32 %v1616_v44, 0.0  ;;  %v2328_v28 = vadd.f32 %v2327_v61, %v2279_v35  ;;  %v2063_v57 = vmax.f32 %v1457_v47, 0.0 }
 0x254   :  { %v2370_v56 = vadd.f32 %v2369_v33, %v2281_v37  ;;  %v2065_v2 = vmax.f32 %v1618_v48, 0.0  ;;  %v2286_v5 = vmul.f32 %v4642_v12, %v2062_v1  ;;  %v1686_v19 = vpop.f32.mrb[64].mxu0  ;;  %v1847_v17 = vpop.f32.mrb[64].mxu1  ;;  %v4648_v24 = vshrl.u32 %v2487_v11, 7 }
 0x255   :  { %v2288_v32 = vmul.f32 %v4642_v12, %v2064_v31  ;;  %v2287_v13 = vmul.f32 %v4642_v12, %v2063_v57  ;;  %v1687_v61 = vadd.f32 %v1686_v19, %v4449_v4  ;;  %v1848_v33 = vadd.f32 %v1847_v17, %v4449_v4  ;;  %v1688_v30 = vpop.f32.mrb[65].mxu0  ;;  %v1849_v39 = vpop.f32.mrb[65].mxu1 }
 0x256   :  { %4832 = vst [vmem:[#allocation9_spill] sm:$0xff] %v4648_v24  ;;  %v2289_v14 = vmul.f32 %v4642_v12, %v2065_v2  ;;  %v2308_v42 = vadd.f32 %v2307_v49, %v2286_v5  ;;  %v1689_v44 = vadd.f32 %v1688_v30, %v4449_v4  ;;  %v1850_v45 = vadd.f32 %v1849_v39, %v4449_v4 }
 0x257   :  { %v2350_v50 = vadd.f32 %v2349_v60, %v2288_v32  ;;  %v2329_v23 = vadd.f32 %v2328_v28, %v2287_v13  ;;  %v1946_v11 = vmax.f32 %v1687_v61, 0.0  ;;  %v1948_v37 = vmax.f32 %v1848_v33, 0.0 }
 0x258   :  { %v2371_v35 = vadd.f32 %v2370_v56, %v2289_v14  ;;  %v2309_v47 = vrot.slane %v2308_v42, 4  ;;  %v1947_v1 = vmax.f32 %v1689_v44, 0.0  ;;  %v1949_v31 = vmax.f32 %v1850_v45, 0.0  ;;  %v1692_v57 = vpop.f32.mrb[66].mxu0  ;;  %v1853_v2 = vpop.f32.mrb[66].mxu1 }
 0x259   :  { %v2351_v48 = vrot.slane %v2350_v50, 4  ;;  %v2330_v19 = vrot.slane %v2329_v23, 4  ;;  %v2170_v18 = vmul.f32 %v4457_v63, %v1946_v11  ;;  %v2172_v49 = vmul.f32 %v4457_v63, %v1948_v37  ;;  %v1694_v60 = vpop.f32.mrb[67].mxu0  ;;  %v1855_v5 = vpop.f32.mrb[67].mxu1 }
 0x25a   :  { %v2372_v17 = vrot.slane %v2371_v35, 4  ;;  %v2310_v32 = vadd.f32 %v2309_v47, %v2308_v42  ;;  %v2171_v28 = vmul.f32 %v4457_v63, %v1947_v1  ;;  %v2173_v56 = vmul.f32 %v4457_v63, %v1949_v31 }
 0x25b   :  { %v2352_v4 = vadd.f32 %v2351_v48, %v2350_v50  ;;  %v2331_v13 = vadd.f32 %v2330_v19, %v2329_v23  ;;  %v1693_v61 = vadd.f32 %v1692_v57, %v4451_v7  ;;  %v1854_v33 = vadd.f32 %v1853_v2, %v4451_v7 }
 0x25c   :  { %v2373_v14 = vadd.f32 %v2372_v17, %v2371_v35  ;;  %v2311_v30 = vrot.slane %v2310_v32, 2  ;;  %v1695_v44 = vadd.f32 %v1694_v60, %v4451_v7  ;;  %v1856_v45 = vadd.f32 %v1855_v5, %v4451_v7  ;;  %v1698_v11 = vpop.f32.mrb[68].mxu0  ;;  %v1859_v37 = vpop.f32.mrb[68].mxu1 }
 0x25d   :  { %v2353_v39 = vrot.slane %v2352_v4, 2  ;;  %v2332_v42 = vrot.slane %v2331_v13, 2  ;;  %v1954_v47 = vmax.f32 %v1693_v61, 0.0  ;;  %v1956_v48 = vmax.f32 %v1854_v33, 0.0  ;;  %v1700_v1 = vpop.f32.mrb[69].mxu0  ;;  %v1861_v63 = vpop.f32.mrb[69].mxu1 }
 0x25e   :  { %v2374_v50 = vrot.slane %v2373_v14, 2  ;;  %v2312_v23 = vadd.f32 %v2311_v30, %v2310_v32  ;;  %v1955_v31 = vmax.f32 %v1695_v44, 0.0  ;;  %v1957_v57 = vmax.f32 %v1856_v45, 0.0 }
 0x25f   :  { %v2354_v35 = vadd.f32 %v2353_v39, %v2352_v4  ;;  %v2333_v19 = vadd.f32 %v2332_v42, %v2331_v13  ;;  %v2178_v17 = vmul.f32 %v4459_v0, %v1954_v47  ;;  %v2180_v60 = vmul.f32 %v4459_v0, %v1956_v48 }
 0x260   :  { %v2375_v2 = vadd.f32 %v2374_v50, %v2373_v14  ;;  %v2313_v10 = vrot.slane %v2312_v23, 1  ;;  %v2179_v5 = vmul.f32 %v4459_v0, %v1955_v31  ;;  %v2181_v24 = vmul.f32 %v4459_v0, %v1957_v57  ;;  %v1704_v61 = vpop.f32.mrb[70].mxu0  ;;  %v1865_v33 = vpop.f32.mrb[70].mxu1 }
 0x261   :  { %v2355_v7 = vrot.slane %v2354_v35, 1  ;;  %v2334_v52 = vrot.slane %v2333_v19, 1  ;;  %v2378_v32 = vadd.f32 %v2178_v17, %v2170_v18  ;;  %v2420_v4 = vadd.f32 %v2180_v60, %v2172_v49  ;;  %v1706_v30 = vpop.f32.mrb[71].mxu0  ;;  %v1867_v39 = vpop.f32.mrb[71].mxu1 }
 0x262   :  { %v2376_v12 = vrot.slane %v2375_v2, 1  ;;  %v4668_v13 = vadd.f32 %v2313_v10, %v2312_v23  ;;  %v2399_v44 = vadd.f32 %v2179_v5, %v2171_v28  ;;  %v2441_v45 = vadd.f32 %v2181_v24, %v2173_v56 }
 0x263   :  { %v4670_v14 = vadd.f32 %v2355_v7, %v2354_v35  ;;  %v4672_v42 = vadd.f32 %v2334_v52, %v2333_v19  ;;  %v1699_v0 = vadd.f32 %v1698_v11, %v4453_v20  ;;  %v1860_v47 = vadd.f32 %v1859_v37, %v4453_v20 }
 0x264   :  { %v4674_v50 = vadd.f32 %v2376_v12, %v2375_v2  ;;  %v1701_v48 = vadd.f32 %v1700_v1, %v4453_v20  ;;  %v1862_v18 = vadd.f32 %v1861_v63, %v4453_v20  ;;  %v1705_v49 = vadd.f32 %v1704_v61, %v4455_v36  ;;  %v1710_v23 = vpop.f32.mrb[72].mxu0  ;;  %v1871_v35 = vpop.f32.mrb[72].mxu1 }
 0x265   :  { %v1866_v10 = vadd.f32 %v1865_v33, %v4455_v36  ;;  %v1962_v28 = vmax.f32 %v1699_v0, 0.0  ;;  %v1964_v24 = vmax.f32 %v1860_v47, 0.0  ;;  %v1707_v52 = vadd.f32 %v1706_v30, %v4455_v36  ;;  %v1712_v56 = vpop.f32.mrb[73].mxu0  ;;  %v1873_v11 = vpop.f32.mrb[73].mxu1 }
 0x266   :  { %v1868_v12 = vadd.f32 %v1867_v39, %v4455_v36  ;;  %v1963_v31 = vmax.f32 %v1701_v48, 0.0  ;;  %v1965_v37 = vmax.f32 %v1862_v18, 0.0  ;;  %v1970_v57 = vmax.f32 %v1705_v49, 0.0 }
 0x267   :  { %v1972_v1 = vmax.f32 %v1866_v10, 0.0  ;;  %v2186_v20 = vmul.f32 %v4463_v46, %v1962_v28  ;;  %v2188_v63 = vmul.f32 %v4463_v46, %v1964_v24  ;;  %v1971_v19 = vmax.f32 %v1707_v52, 0.0 }
 0x268   :  { %v1973_v2 = vmax.f32 %v1868_v12, 0.0  ;;  %v2187_v17 = vmul.f32 %v4463_v46, %v1963_v31  ;;  %v2189_v60 = vmul.f32 %v4463_v46, %v1965_v37  ;;  %v2194_v7 = vmul.f32 %v4467_v3, %v1970_v57  ;;  %v1716_v5 = vpop.f32.mrb[74].mxu0  ;;  %v1877_v61 = vpop.f32.mrb[74].mxu1 }
 0x269   :  { %v2196_v36 = vmul.f32 %v4467_v3, %v1972_v1  ;;  %v2379_v33 = vadd.f32 %v2378_v32, %v2186_v20  ;;  %v2421_v30 = vadd.f32 %v2420_v4, %v2188_v63  ;;  %v2195_v39 = vmul.f32 %v4467_v3, %v1971_v19  ;;  %v1718_v47 = vpop.f32.mrb[75].mxu0  ;;  %v1879_v48 = vpop.f32.mrb[75].mxu1 }
 0x26a   :  { %v2197_v0 = vmul.f32 %v4467_v3, %v1973_v2  ;;  %v2400_v18 = vadd.f32 %v2399_v44, %v2187_v17  ;;  %v2442_v49 = vadd.f32 %v2441_v45, %v2189_v60  ;;  %v1711_v10 = vadd.f32 %v1710_v23, %v4461_v53 }
 0x26b   :  { %v1872_v46 = vadd.f32 %v1871_v35, %v4461_v53  ;;  %v2380_v28 = vadd.f32 %v2379_v33, %v2194_v7  ;;  %v2422_v24 = vadd.f32 %v2421_v30, %v2196_v36  ;;  %v1713_v52 = vadd.f32 %v1712_v56, %v4461_v53 }
 0x26c   :  { %v1874_v12 = vadd.f32 %v1873_v11, %v4461_v53  ;;  %v2401_v32 = vadd.f32 %v2400_v18, %v2195_v39  ;;  %v2443_v4 = vadd.f32 %v2442_v49, %v2197_v0  ;;  %v1978_v31 = vmax.f32 %v1711_v10, 0.0  ;;  %v1722_v57 = vpop.f32.mrb[76].mxu0  ;;  %v1883_v3 = vpop.f32.mrb[76].mxu1 }
 0x26d   :  { %v1980_v37 = vmax.f32 %v1872_v46, 0.0  ;;  %v1979_v1 = vmax.f32 %v1713_v52, 0.0  ;;  %v1717_v44 = vadd.f32 %v1716_v5, %v4465_v8  ;;  %v1878_v45 = vadd.f32 %v1877_v61, %v4465_v8  ;;  %v1724_v23 = vpop.f32.mrb[77].mxu0  ;;  %v1885_v35 = vpop.f32.mrb[77].mxu1 }
 0x26e   :  { %v1981_v20 = vmax.f32 %v1874_v12, 0.0  ;;  %v2202_v63 = vmul.f32 %v4471_v62, %v1978_v31  ;;  %v1719_v53 = vadd.f32 %v1718_v47, %v4465_v8  ;;  %v1880_v11 = vadd.f32 %v1879_v48, %v4465_v8 }
 0x26f   :  { %v2204_v56 = vmul.f32 %v4471_v62, %v1980_v37  ;;  %v2203_v19 = vmul.f32 %v4471_v62, %v1979_v1  ;;  %v1986_v17 = vmax.f32 %v1717_v44, 0.0  ;;  %v1988_v60 = vmax.f32 %v1878_v45, 0.0 }
 0x270   :  { %v2205_v2 = vmul.f32 %v4471_v62, %v1981_v20  ;;  %v2381_v7 = vadd.f32 %v2380_v28, %v2202_v63  ;;  %v1987_v5 = vmax.f32 %v1719_v53, 0.0  ;;  %v1989_v61 = vmax.f32 %v1880_v11, 0.0  ;;  %v1728_v33 = vpop.f32.mrb[78].mxu0  ;;  %v1889_v30 = vpop.f32.mrb[78].mxu1 }
 0x271   :  { %v2423_v36 = vadd.f32 %v2422_v24, %v2204_v56  ;;  %v2402_v39 = vadd.f32 %v2401_v32, %v2203_v19  ;;  %v2210_v18 = vmul.f32 %v4475_v25, %v1986_v17  ;;  %v2212_v47 = vmul.f32 %v4475_v25, %v1988_v60  ;;  %v1730_v49 = vpop.f32.mrb[79].mxu0  ;;  %v1891_v8 = vpop.f32.mrb[79].mxu1 }
 0x272   :  { %v2444_v0 = vadd.f32 %v2443_v4, %v2205_v2  ;;  %v2211_v48 = vmul.f32 %v4475_v25, %v1987_v5  ;;  %v2213_v62 = vmul.f32 %v4475_v25, %v1989_v61  ;;  %v1723_v10 = vadd.f32 %v1722_v57, %v4469_v41 }
 0x273   :  { %v1884_v46 = vadd.f32 %v1883_v3, %v4469_v41  ;;  %v2382_v28 = vadd.f32 %v2381_v7, %v2210_v18  ;;  %v2424_v24 = vadd.f32 %v2423_v36, %v2212_v47  ;;  %v1725_v52 = vadd.f32 %v1724_v23, %v4469_v41 }
 0x274   :  { %v1886_v12 = vadd.f32 %v1885_v35, %v4469_v41  ;;  %v2403_v32 = vadd.f32 %v2402_v39, %v2211_v48  ;;  %v2445_v4 = vadd.f32 %v2444_v0, %v2213_v62  ;;  %v1994_v31 = vmax.f32 %v1723_v10, 0.0  ;;  %v1734_v1 = vpop.f32.mrb[80].mxu0  ;;  %v1895_v20 = vpop.f32.mrb[80].mxu1 }
 0x275   :  { %v1996_v37 = vmax.f32 %v1884_v46, 0.0  ;;  %v1995_v44 = vmax.f32 %v1725_v52, 0.0  ;;  %v1729_v25 = vadd.f32 %v1728_v33, %v4473_v15  ;;  %v1890_v57 = vadd.f32 %v1889_v30, %v4473_v15  ;;  %v1736_v63 = vpop.f32.mrb[81].mxu0  ;;  %v1897_v3 = vpop.f32.mrb[81].mxu1 }
 0x276   :  { %v1997_v45 = vmax.f32 %v1886_v12, 0.0  ;;  %v2218_v56 = vmul.f32 %v4479_v27, %v1994_v31  ;;  %v1731_v41 = vadd.f32 %v1730_v49, %v4473_v15  ;;  %v1892_v35 = vadd.f32 %v1891_v8, %v4473_v15 }
 0x277   :  { %v2220_v23 = vmul.f32 %v4479_v27, %v1996_v37  ;;  %v2219_v53 = vmul.f32 %v4479_v27, %v1995_v44  ;;  %v2002_v19 = vmax.f32 %v1729_v25, 0.0  ;;  %v2004_v2 = vmax.f32 %v1890_v57, 0.0 }
 0x278   :  { %v2221_v11 = vmul.f32 %v4479_v27, %v1997_v45  ;;  %v2383_v17 = vadd.f32 %v2382_v28, %v2218_v56  ;;  %v2003_v7 = vmax.f32 %v1731_v41, 0.0  ;;  %v2005_v36 = vmax.f32 %v1892_v35, 0.0  ;;  %v1740_v5 = vpop.f32.mrb[82].mxu0  ;;  %v1901_v61 = vpop.f32.mrb[82].mxu1 }
 0x279   :  { %v2425_v60 = vadd.f32 %v2424_v24, %v2220_v23  ;;  %v2404_v33 = vadd.f32 %v2403_v32, %v2219_v53  ;;  %v2226_v39 = vmul.f32 %v4499_v58, %v2002_v19  ;;  %v2228_v0 = vmul.f32 %v4499_v58, %v2004_v2  ;;  %v1742_v18 = vpop.f32.mrb[83].mxu0  ;;  %v1903_v15 = vpop.f32.mrb[83].mxu1 }
 0x27a   :  { %v2446_v30 = vadd.f32 %v2445_v4, %v2221_v11  ;;  %v2227_v47 = vmul.f32 %v4499_v58, %v2003_v7  ;;  %v2229_v27 = vmul.f32 %v4499_v58, %v2005_v36  ;;  %v1735_v49 = vadd.f32 %v1734_v1, %v4477_v26 }
 0x27b   :  { %v1896_v8 = vadd.f32 %v1895_v20, %v4477_v26  ;;  %v2384_v48 = vadd.f32 %v2383_v17, %v2226_v39  ;;  %v2426_v62 = vadd.f32 %v2425_v60, %v2228_v0  ;;  %v1737_v10 = vadd.f32 %v1736_v63, %v4477_v26 }
 0x27c   :  { %v1898_v46 = vadd.f32 %v1897_v3, %v4477_v26  ;;  %v2405_v28 = vadd.f32 %v2404_v33, %v2227_v47  ;;  %v2447_v24 = vadd.f32 %v2446_v30, %v2229_v27  ;;  %v2010_v52 = vmax.f32 %v1735_v49, 0.0  ;;  %v1746_v32 = vpop.f32.mrb[84].mxu0  ;;  %v1907_v4 = vpop.f32.mrb[84].mxu1 }
 0x27d   :  { %v2012_v12 = vmax.f32 %v1896_v8, 0.0  ;;  %v2011_v31 = vmax.f32 %v1737_v10, 0.0  ;;  %v1741_v58 = vadd.f32 %v1740_v5, %v4485_v40  ;;  %v1902_v1 = vadd.f32 %v1901_v61, %v4485_v40  ;;  %v1748_v44 = vpop.f32.mrb[85].mxu0  ;;  %v1909_v20 = vpop.f32.mrb[85].mxu1 }
 0x27e   :  { %v2013_v37 = vmax.f32 %v1898_v46, 0.0  ;;  %v2234_v45 = vmul.f32 %v4522_v54, %v2010_v52  ;;  %v1743_v26 = vadd.f32 %v1742_v18, %v4485_v40  ;;  %v1904_v57 = vadd.f32 %v1903_v15, %v4485_v40 }
 0x27f   :  { %v2236_v25 = vmul.f32 %v4522_v54, %v2012_v12  ;;  %v2235_v63 = vmul.f32 %v4522_v54, %v2011_v31  ;;  %v2018_v56 = vmax.f32 %v1741_v58, 0.0  ;;  %v2020_v23 = vmax.f32 %v1902_v1, 0.0 }
 0x280   :  { %v2237_v3 = vmul.f32 %v4522_v54, %v2013_v37  ;;  %v2385_v41 = vadd.f32 %v2384_v48, %v2234_v45  ;;  %v2019_v53 = vmax.f32 %v1743_v26, 0.0  ;;  %v2021_v11 = vmax.f32 %v1904_v57, 0.0  ;;  %v1752_v19 = vpop.f32.mrb[86].mxu0  ;;  %v1913_v2 = vpop.f32.mrb[86].mxu1 }
 0x281   :  { %v2427_v35 = vadd.f32 %v2426_v62, %v2236_v25  ;;  %v2406_v17 = vadd.f32 %v2405_v28, %v2235_v63  ;;  %v2242_v7 = vmul.f32 %v4542_v55, %v2018_v56  ;;  %v2244_v36 = vmul.f32 %v4542_v55, %v2020_v23  ;;  %v1754_v5 = vpop.f32.mrb[87].mxu0  ;;  %v1915_v40 = vpop.f32.mrb[87].mxu1 }
 0x282   :  { %v2448_v60 = vadd.f32 %v2447_v24, %v2237_v3  ;;  %v2243_v61 = vmul.f32 %v4542_v55, %v2019_v53  ;;  %v2245_v54 = vmul.f32 %v4542_v55, %v2021_v11  ;;  %v1747_v33 = vadd.f32 %v1746_v32, %v4512_v22 }
 0x283   :  { %v1908_v30 = vadd.f32 %v1907_v4, %v4512_v22  ;;  %v2386_v39 = vadd.f32 %v2385_v41, %v2242_v7  ;;  %v2428_v0 = vadd.f32 %v2427_v35, %v2244_v36  ;;  %v1749_v18 = vadd.f32 %v1748_v44, %v4512_v22 }
 0x284   :  { %v1910_v15 = vadd.f32 %v1909_v20, %v4512_v22  ;;  %v2407_v47 = vadd.f32 %v2406_v17, %v2243_v61  ;;  %v2449_v27 = vadd.f32 %v2448_v60, %v2245_v54  ;;  %v2026_v49 = vmax.f32 %v1747_v33, 0.0  ;;  %v1758_v48 = vpop.f32.mrb[88].mxu0  ;;  %v1919_v62 = vpop.f32.mrb[88].mxu1 }
 0x285   :  { %v2028_v8 = vmax.f32 %v1908_v30, 0.0  ;;  %v2027_v10 = vmax.f32 %v1749_v18, 0.0  ;;  %v1753_v55 = vadd.f32 %v1752_v19, %v4532_v21  ;;  %v1914_v28 = vadd.f32 %v1913_v2, %v4532_v21  ;;  %v1760_v24 = vpop.f32.mrb[89].mxu0  ;;  %v1921_v52 = vpop.f32.mrb[89].mxu1 }
 0x286   :  { %v2029_v46 = vmax.f32 %v1910_v15, 0.0  ;;  %v2250_v12 = vmul.f32 %v4562_v59, %v2026_v49  ;;  %v1755_v22 = vadd.f32 %v1754_v5, %v4532_v21  ;;  %v1916_v4 = vadd.f32 %v1915_v40, %v4532_v21 }
 0x287   :  { %v2252_v32 = vmul.f32 %v4562_v59, %v2028_v8  ;;  %v2251_v31 = vmul.f32 %v4562_v59, %v2027_v10  ;;  %v2034_v58 = vmax.f32 %v1753_v55, 0.0  ;;  %v2036_v1 = vmax.f32 %v1914_v28, 0.0 }
 0x288   :  { %v2253_v37 = vmul.f32 %v4562_v59, %v2029_v46  ;;  %v2387_v44 = vadd.f32 %v2386_v39, %v2250_v12  ;;  %v2035_v45 = vmax.f32 %v1755_v22, 0.0  ;;  %v2037_v25 = vmax.f32 %v1916_v4, 0.0  ;;  %v1764_v26 = vpop.f32.mrb[90].mxu0  ;;  %v1925_v57 = vpop.f32.mrb[90].mxu1 }
 0x289   :  { %v2429_v20 = vadd.f32 %v2428_v0, %v2252_v32  ;;  %v2408_v63 = vadd.f32 %v2407_v47, %v2251_v31  ;;  %v2258_v56 = vmul.f32 %v4582_v6, %v2034_v58  ;;  %v2260_v23 = vmul.f32 %v4582_v6, %v2036_v1  ;;  %v1766_v41 = vpop.f32.mrb[91].mxu0  ;;  %v1927_v21 = vpop.f32.mrb[91].mxu1 }
 0x28a   :  { %v2450_v3 = vadd.f32 %v2449_v27, %v2253_v37  ;;  %v2259_v35 = vmul.f32 %v4582_v6, %v2035_v45  ;;  %v2261_v59 = vmul.f32 %v4582_v6, %v2037_v25  ;;  %v1759_v53 = vadd.f32 %v1758_v48, %v4552_v29 }
 0x28b   :  { %v1920_v11 = vadd.f32 %v1919_v62, %v4552_v29  ;;  %v2388_v19 = vadd.f32 %v2387_v44, %v2258_v56  ;;  %v2430_v2 = vadd.f32 %v2429_v20, %v2260_v23  ;;  %v1761_v17 = vadd.f32 %v1760_v24, %v4552_v29 }
 0x28c   :  { %v1922_v60 = vadd.f32 %v1921_v52, %v4552_v29  ;;  %v2409_v7 = vadd.f32 %v2408_v63, %v2259_v35  ;;  %v2451_v36 = vadd.f32 %v2450_v3, %v2261_v59  ;;  %v2042_v5 = vmax.f32 %v1759_v53, 0.0  ;;  %v1770_v61 = vpop.f32.mrb[92].mxu0  ;;  %v1931_v54 = vpop.f32.mrb[92].mxu1 }
 0x28d   :  { %v2044_v40 = vmax.f32 %v1920_v11, 0.0  ;;  %v2043_v33 = vmax.f32 %v1761_v17, 0.0  ;;  %v1765_v6 = vadd.f32 %v1764_v26, %v4572_v34  ;;  %v1926_v39 = vadd.f32 %v1925_v57, %v4572_v34  ;;  %v1772_v0 = vpop.f32.mrb[93].mxu0  ;;  %v1933_v18 = vpop.f32.mrb[93].mxu1 }
 0x28e   :  { %v2045_v30 = vmax.f32 %v1922_v60, 0.0  ;;  %v2266_v15 = vmul.f32 %v4602_v16, %v2042_v5  ;;  %v1767_v29 = vadd.f32 %v1766_v41, %v4572_v34  ;;  %v1928_v27 = vadd.f32 %v1927_v21, %v4572_v34 }
 0x28f   :  { %v2268_v47 = vmul.f32 %v4602_v16, %v2044_v40  ;;  %v2267_v49 = vmul.f32 %v4602_v16, %v2043_v33  ;;  %v2050_v48 = vmax.f32 %v1765_v6, 0.0  ;;  %v2052_v62 = vmax.f32 %v1926_v39, 0.0  ;;  %v4834_v6 = vld [vmem:[#allocation6_spill] sm:$0xff] }
 0x290   :  { %v2269_v8 = vmul.f32 %v4602_v16, %v2045_v30  ;;  %v2389_v10 = vadd.f32 %v2388_v19, %v2266_v15  ;;  %v2051_v55 = vmax.f32 %v1767_v29, 0.0  ;;  %v2053_v28 = vmax.f32 %v1928_v27, 0.0  ;;  %v1776_v24 = vpop.f32.mrb[94].mxu0  ;;  %v1937_v52 = vpop.f32.mrb[94].mxu1 }
 0x291   :  { %v2431_v46 = vadd.f32 %v2430_v2, %v2268_v47  ;;  %v2410_v12 = vadd.f32 %v2409_v7, %v2267_v49  ;;  %v2274_v22 = vmul.f32 %v4622_v38, %v2050_v48  ;;  %v2276_v4 = vmul.f32 %v4622_v38, %v2052_v62  ;;  %v1778_v31 = vpop.f32.mrb[95].mxu0  ;;  %v1939_v34 = vpop.f32.mrb[95].mxu1  ;;  %v4836_v48 = vld [vmem:[#allocation7_spill] sm:$0xff] }
 0x292   :  { %v2452_v32 = vadd.f32 %v2451_v36, %v2269_v8  ;;  %v2275_v37 = vmul.f32 %v4622_v38, %v2051_v55  ;;  %v2277_v16 = vmul.f32 %v4622_v38, %v2053_v28  ;;  %v1771_v58 = vadd.f32 %v1770_v61, %v4592_v43  ;;  %v4833_v61 = vld [vmem:[#allocation8_spill] sm:$0xff]  ;;  %v4835_v8 = vld [vmem:[#allocation9_spill] sm:$0xff] }
 0x293   :  { %v1932_v1 = vadd.f32 %v1931_v54, %v4592_v43  ;;  %v2390_v44 = vadd.f32 %v2389_v10, %v2274_v22  ;;  %v2432_v20 = vadd.f32 %v2431_v46, %v2276_v4  ;;  %v1773_v45 = vadd.f32 %v1772_v0, %v4592_v43 }
 0x294   :  { %v1934_v25 = vadd.f32 %v1933_v18, %v4592_v43  ;;  %v2411_v26 = vadd.f32 %v2410_v12, %v2275_v37  ;;  %v2453_v57 = vadd.f32 %v2452_v32, %v2277_v16  ;;  %v2058_v63 = vmax.f32 %v1771_v58, 0.0 }
 0x295   :  { %v2060_v3 = vmax.f32 %v1932_v1, 0.0  ;;  %v2059_v56 = vmax.f32 %v1773_v45, 0.0  ;;  %v1777_v41 = vadd.f32 %v1776_v24, %v4612_v51  ;;  %v1938_v38 = vadd.f32 %v1937_v52, %v4612_v51 }
 0x296   :  { %v2061_v23 = vmax.f32 %v1934_v25, 0.0  ;;  %v2282_v21 = vmul.f32 %v4632_v9, %v2058_v63  ;;  %v1779_v59 = vadd.f32 %v1778_v31, %v4612_v51  ;;  %v1940_v53 = vadd.f32 %v1939_v34, %v4612_v51 }
 0x297   :  { %v2284_v35 = vmul.f32 %v4632_v9, %v2060_v3  ;;  %v2283_v43 = vmul.f32 %v4632_v9, %v2059_v56  ;;  %v2066_v19 = vmax.f32 %v1777_v41, 0.0  ;;  %v2068_v2 = vmax.f32 %v1938_v38, 0.0 }
 0x298   :  { %v2285_v11 = vmul.f32 %v4632_v9, %v2061_v23  ;;  %v2391_v17 = vadd.f32 %v2390_v44, %v2282_v21  ;;  %v2067_v7 = vmax.f32 %v1779_v59, 0.0  ;;  %v2069_v36 = vmax.f32 %v1940_v53, 0.0 }
 0x299   :  { %v2433_v60 = vadd.f32 %v2432_v20, %v2284_v35  ;;  %v2412_v5 = vadd.f32 %v2411_v26, %v2283_v43  ;;  %v2290_v54 = vmul.f32 %v4833_v61, %v2066_v19  ;;  %v2292_v33 = vmul.f32 %v4833_v61, %v2068_v2 }
 0x29a   :  { %v2454_v40 = vadd.f32 %v2453_v57, %v2285_v11  ;;  %v2291_v30 = vmul.f32 %v4833_v61, %v2067_v7  ;;  %v2293_v51 = vmul.f32 %v4833_v61, %v2069_v36  ;;  %v2464_v39 = vadd.f32 %v4834_v6, %v4668_v13 }
 0x29b   :  { %v2465_v9 = vadd.f32 %v4834_v6, %v4672_v42  ;;  %v2392_v0 = vadd.f32 %v2391_v17, %v2290_v54  ;;  %v2434_v18 = vadd.f32 %v2433_v60, %v2292_v33  ;;  %v2466_v15 = vadd.f32 %v4834_v6, %v4670_v14 }
 0x29c   :  { %v2467_v47 = vadd.f32 %v4834_v6, %v4674_v50  ;;  %v2413_v29 = vadd.f32 %v2412_v5, %v2291_v30  ;;  %v2455_v27 = vadd.f32 %v2454_v40, %v2293_v51  ;;  %v4837_v62 = vunpack.c.0.s8 %v4836_v48 }
 0x29d   :  { %v2480_v49 = vcombine.low %v2464_v39, %v2465_v9  ;;  %v2393_v46 = vrot.slane %v2392_v0, 4  ;;  %v2435_v13 = vrot.slane %v2434_v18, 4 }
 0x29e   :  { %v2489_v10 = vsub.s32 %v4837_v62, %v4835_v8  ;;  %v2481_v55 = vcombine.low %v2466_v15, %v2467_v47  ;;  %v2414_v28 = vrot.slane %v2413_v29, 4  ;;  %v2456_v42 = vrot.slane %v2455_v27, 4 }
 0x29f   :  { %v2394_v52 = vadd.f32 %v2393_v46, %v2392_v0  ;;  %v2436_v12 = vadd.f32 %v2435_v13, %v2434_v18 }
 0x2a0   :  { %v2490_v24 = vrot.slane %v2480_v49, %v2489_v10  ;;  %v2497_v32 = vrot.slane %v2481_v55, %v2489_v10  ;;  %v2415_v14 = vadd.f32 %v2414_v28, %v2413_v29  ;;  %v2457_v22 = vadd.f32 %v2456_v42, %v2455_v27 }
 0x2a1   :  { %v2395_v4 = vrot.slane %v2394_v52, 2  ;;  %v2437_v50 = vrot.slane %v2436_v12, 2 }
 0x2a2   :  { %v2512_v31 = vcombine.low %v2490_v24, %v2497_v32  ;;  %v2416_v34 = vrot.slane %v2415_v14, 2  ;;  %v2458_v37 = vrot.slane %v2457_v22, 2 }
 0x2a3   :  { %v2396_v16 = vadd.f32 %v2395_v4, %v2394_v52  ;;  %v2438_v58 = vadd.f32 %v2437_v50, %v2436_v12 }
 0x2a4   :  { %v2417_v1 = vadd.f32 %v2416_v34, %v2415_v14  ;;  %v2459_v44 = vadd.f32 %v2458_v37, %v2457_v22  ;;  %v2520_v19 = vrot.slane %v2512_v31, %v2489_v10 }
 0x2a5   :  { %v2397_v20 = vrot.slane %v2396_v16, 1  ;;  %v2439_v45 = vrot.slane %v2438_v58, 1 }
 0x2a6   :  { %v2418_v25 = vrot.slane %v2417_v1, 1  ;;  %v2460_v26 = vrot.slane %v2459_v44, 1 }
 0x2a7   :  { %v2398_v57 = vadd.f32 %v2397_v20, %v2396_v16  ;;  %v2440_v63 = vadd.f32 %v2439_v45, %v2438_v58 }
 0x2a8   :  { %v2419_v3 = vadd.f32 %v2418_v25, %v2417_v1  ;;  %v2461_v56 = vadd.f32 %v2460_v26, %v2459_v44 }
 0x2a9   :  { %v2468_v23 = vadd.f32 %v4834_v6, %v2398_v57  ;;  %v2470_v41 = vadd.f32 %v4834_v6, %v2440_v63 }
 0x2aa   :  { %v2469_v38 = vadd.f32 %v4834_v6, %v2419_v3  ;;  %v2471_v21 = vadd.f32 %v4834_v6, %v2461_v56 }
 0x2ac   :  { %v2482_v35 = vcombine.low %v2468_v23, %v2469_v38  ;;  %v2483_v59 = vcombine.low %v2470_v41, %v2471_v21 }
 0x2ae   :  { %v2504_v53 = vrot.slane %v2482_v35, %v2489_v10  ;;  %v2511_v43 = vrot.slane %v2483_v59, %v2489_v10 }
 0x2b0   :  { %v2513_v11 = vcombine.low %v2504_v53, %v2511_v43 }
 0x2b2   :  { %v2527_v2 = vrot.slane %v2513_v11, %v2489_v10 }
 0x2b4   :  { %v2528_v17 = vcombine.low %v2520_v19, %v2527_v2 }
 0x2b6   :  { %2530 = vst [vmem:[#allocation3] sm:$0xff] %v2528_v17 }
 0x2b7   :  { %3234 = shalt.err (!%p3231_p4)
}
 0x2b8   :  { %s3235_s1 = scalar_lea.hbm %s4822_s7, 128 }
 0x2b9   :  { %p3236_p5 = scmp.ne.s32.totalorder %s4822_s7, %s3235_s1  ;;  %p3239_p6 = scmp.lt.u32.totalorder %s3235_s1, %s4822_s7 }
 0x2bb   :  { %p3241_p7 = pnand %p3239_p6, %p3236_p5 }
 0x2bd   :  { %3244 = shalt.err (!%p3241_p7)
}
 0x2be   :  { %2540 = dma.vmem_to_hbm [thread:$0]  %s2538_s20, 128, %s4822_s7, [#allocation4]  }
 0x2bf   :  { %3245 = dma.done.wait [#allocation4], 128  }
 0x2c0   :  { %3246 = vsyncadd [#allocation4], 4294967168 }
 0x2c1   :  { %2544 = vsyncpa [#allocation4], 1 }

</bundles_post_ra>
